<compile_context>
chip_gen: v7x
topology: tpu7x:2x2x1
jax: 0.10.0
libtpu: 0.0.40
codegen_flags: <defaults>
</compile_context>

<pallas_src>
import numpy as np
import jax
import jax.numpy as jnp
from jax.experimental import pallas as pl
from jax.experimental.pallas import tpu as pltpu

WIN = 11
PAD = WIN // 2
C1 = 0.01 ** 2
C2 = 0.03 ** 2


def _gaussian_1d(window_size, sigma):
    xs = np.arange(window_size, dtype=np.float64)
    g = np.exp(-((xs - window_size // 2) ** 2) / (2.0 * sigma ** 2))
    return (g / g.sum()).astype(np.float32)


def _conv_matrix_same(n, g):
    # K[q, o] = g[q - o + PAD]; out = x @ K implements a zero-padded 'same' 1D conv:
    #   out[o] = sum_j g[j] * x[o + j - PAD]   (out-of-range x treated as 0)
    K = np.zeros((n, n), dtype=np.float32)
    for o in range(n):
        for j in range(WIN):
            q = o + j - PAD
            if 0 <= q < n:
                K[q, o] = g[j]
    return K


def _make_kernel(bc_total, block_bc, num_tiles, needs_mask):
    def kernel(x1_ref, x2_ref, kw_ref, kh_ref, out_ref):
        i = pl.program_id(0)
        x1 = x1_ref[...].astype(jnp.float32)    # (TB, H, W)
        x2 = x2_ref[...].astype(jnp.float32)    # (TB, H, W)
        kw = kw_ref[...]                        # (W, W) bf16, 'same' col conv: out = x @ kw
        kh = kh_ref[...]                        # (H, H) bf16, (K=p, N=h) orientation

        tb, h, w = x1.shape

        # Fuse the five blurs: stack along the leading axis; bf16 MXU operands.
        parts = [x1, x2, x1 * x1, x2 * x2, x1 * x2]
        s = jnp.concatenate([p.astype(jnp.bfloat16) for p in parts], axis=0)  # (5*TB, H, W)

        # Separable gaussian blur: both convs as large-M flat MXU matmuls (f32 accumulate).
        # 1) conv along W.
        t = jnp.dot(s.reshape(5 * tb * h, w), kw,
                    preferred_element_type=jnp.float32)                       # (5*TB*H, W)
        # 2) conv along H: transpose once to (b, w, p), flat matmul against kh (p, h);
        #    keep the result in (b, w, h) layout — only scalar sums leave the kernel.
        tt = jnp.swapaxes(t.reshape(5 * tb, h, w), 1, 2)                      # (5*TB, W, H)
        blur = jnp.dot(tt.astype(jnp.bfloat16).reshape(5 * tb * w, h), kh,
                       preferred_element_type=jnp.float32)
        blur = blur.reshape(5 * tb, w, h)                                     # (b, w, h)

        mu1 = blur[0 * tb:1 * tb]
        mu2 = blur[1 * tb:2 * tb]
        e11 = blur[2 * tb:3 * tb]
        e22 = blur[3 * tb:4 * tb]
        e12 = blur[4 * tb:5 * tb]

        mu1_sq = mu1 * mu1
        mu2_sq = mu2 * mu2
        mu1_mu2 = mu1 * mu2
        sigma1_sq = e11 - mu1_sq
        sigma2_sq = e22 - mu2_sq
        sigma12 = e12 - mu1_mu2

        num = (2.0 * mu1_mu2 + C1) * (2.0 * sigma12 + C2)
        den = (mu1_sq + mu2_sq + C1) * (sigma1_sq + sigma2_sq + C2)
        ssim_map = num * pl.reciprocal(den, approx=True)                      # (TB, W, H)

        diff = x1 - x2
        sq = diff * diff                                                      # (TB, H, W)

        def emit(ssim_sum, sq_sum):
            # Lane-dense per-step output block: sublane 0 = sum(ssim), sublane 1 = sum(sq).
            sub = jax.lax.broadcasted_iota(jnp.int32, (8, 128), 0)
            out_ref[0] = jnp.where(sub == 0, ssim_sum,
                                   jnp.where(sub == 1, sq_sum, 0.0))

        if needs_mask:
            last = num_tiles - 1

            @pl.when(i != last)
            def _():
                emit(jnp.sum(ssim_map), jnp.sum(sq))

            @pl.when(i == last)
            def _():
                # The last block is ragged: rows past bc_total hold undefined data, so
                # mask them out of BOTH sums (no wrapper-side jnp.pad anymore).
                base = i * block_bc
                valid_s = (base + jax.lax.broadcasted_iota(
                    jnp.int32, ssim_map.shape, 0)) < bc_total
                valid_q = (base + jax.lax.broadcasted_iota(
                    jnp.int32, sq.shape, 0)) < bc_total
                emit(jnp.sum(jnp.where(valid_s, ssim_map, 0.0)),
                     jnp.sum(jnp.where(valid_q, sq, 0.0)))
        else:
            emit(jnp.sum(ssim_map), jnp.sum(sq))

    return kernel


def _tpu_vmem_budget():
    """Returns (per-tile working-set budget, vmem_limit cap) in bytes, per generation."""
    try:
        cap = int(pltpu.get_tpu_info().vmem_capacity_bytes)
    except Exception:
        cap = 64 * 1024 * 1024                       # conservative (v7x-sized) fallback
    if cap >= 96 * 1024 * 1024:                      # v5e / v6e: 128 MiB physical VMEM
        return 56 * 1024 * 1024, 100 * 1024 * 1024
    return 28 * 1024 * 1024, 48 * 1024 * 1024        # v7x: 64 MiB physical VMEM


def _pick_block_bc(bc, h, w, budget):
    # ~112 B/pixel live per batch row at peak: double-buffered inputs + bf16 stack +
    # f32/bf16 conv intermediates + SSIM elementwise temps.
    per_row = 112 * h * w
    tb = max(1, budget // per_row)
    if tb >= 8:
        tb = (tb // 8) * 8
    return int(min(bc, tb))


def _vmem_limit_bytes(block_bc, h, w, limit_cap):
    est = 112 * block_bc * h * w + 4 * (h * h + w * w) + 2 * 8 * 128 * 4
    return int(min(max(int(est * 1.5), 32 * 1024 * 1024), limit_cap))


def hybrid_loss(output, target, block_bc=None):
    output = jnp.asarray(output)   # keep the model's dtype (no forced f32 upcast/HBM copy)
    target = jnp.asarray(target)
    N, C, H, W = output.shape
    BC = N * C
    x1 = output.reshape(BC, H, W)
    x2 = target.reshape(BC, H, W)

    budget, limit_cap = _tpu_vmem_budget()
    if block_bc is None:
        block_bc = _pick_block_bc(BC, H, W, budget)
    block_bc = int(max(1, min(block_bc, BC)))
    num_tiles = -(-BC // block_bc)                 # cdiv; last tile may be ragged
    needs_mask = (num_tiles * block_bc) != BC      # masked in-kernel, no jnp.pad

    g = _gaussian_1d(WIN, 1.5)
    kw = jnp.asarray(_conv_matrix_same(W, g), dtype=jnp.bfloat16)   # (W, W)
    kh = jnp.asarray(_conv_matrix_same(H, g), dtype=jnp.bfloat16)   # (H, H)

    kernel = _make_kernel(BC, block_bc, num_tiles, needs_mask)

    itemsize = int(output.dtype.itemsize)
    flops = (2 * 5 * BC * H * W * W            # W-conv
             + 2 * 5 * BC * W * H * H          # H-conv
             + 30 * BC * H * W)                # elementwise SSIM / MSE math
    cost = pl.CostEstimate(
        flops=int(flops),
        transcendentals=int(BC * H * W),       # approx reciprocal
        bytes_accessed=int(2 * BC * H * W * itemsize
                           + 2 * (H * H + W * W)
                           + num_tiles * 8 * 128 * 4),
    )

    partials = pl.pallas_call(
        kernel,
        out_shape=jax.ShapeDtypeStruct((num_tiles, 8, 128), jnp.float32),
        grid=(num_tiles,),
        in_specs=[
            pl.BlockSpec((block_bc, H, W), lambda i: (i, 0, 0)),   # img1 tile
            pl.BlockSpec((block_bc, H, W), lambda i: (i, 0, 0)),   # img2 tile
            # TODO(synk): on v7x, pipeline_mode=pl.Buffered(1) on these resident matrices
            #             would reclaim one redundant double-buffer each.
            pl.BlockSpec((W, W), lambda i: (0, 0)),                # Kw (resident)
            pl.BlockSpec((H, H), lambda i: (0, 0)),                # Kh (resident)
        ],
        out_specs=pl.BlockSpec((1, 8, 128), lambda i: (i, 0, 0)),  # disjoint per-step block
        compiler_params=pltpu.CompilerParams(
            dimension_semantics=("parallel",),
            vmem_limit_bytes=_vmem_limit_bytes(block_bc, H, W, limit_cap),
        ),
        cost_estimate=cost,
    )(x1, x2, kw, kh)

    n_elem = BC * H * W
    ssim_mean = jnp.sum(partials[:, 0, 0]) / n_elem
    mse = jnp.sum(partials[:, 1, 0]) / n_elem
    # TODO(synk): VGGPerceptualLoss term omitted (class not defined in the provided source).
    return mse + 0.1 * (1.0 - ssim_mean)


if __name__ == "__main__":
    key = jax.random.PRNGKey(0)
    k1, k2 = jax.random.split(key)
    # Small image-like inputs consistent with the module (NCHW, 3 channels).
    output = jax.random.uniform(k1, (2, 3, 16, 16), dtype=jnp.float32)
    target = jax.random.uniform(k2, (2, 3, 16, 16), dtype=jnp.float32)

    # block_bc=4 -> BC=6 splits into 2 grid steps with a ragged last tile, exercising the
    # parallel grid axis, per-step output blocks and the last-tile batch-row masking.
    loss = hybrid_loss(output, target, block_bc=4)
    jax.block_until_ready(loss)
    print("KERNEL_OK")
</pallas_src>

<mosaic_0001>
module attributes {stable_mosaic.version = 11 : i64} {
  func.func @kernel(%arg0: i32, %arg1: memref<4x16x16xf32, #tpu.memory_space<vmem>>, %arg2: memref<4x16x16xf32, #tpu.memory_space<vmem>>, %arg3: memref<16x16xbf16, #tpu.memory_space<vmem>>, %arg4: memref<16x16xbf16, #tpu.memory_space<vmem>>, %arg5: memref<1x8x128xf32, #tpu.memory_space<vmem>>) attributes {dimension_semantics = [#tpu.dimension_semantics<parallel>], iteration_bounds = array<i64: 2>, scalar_prefetch = 0 : i64, scratch_operands = 0 : i64, tpu.core_type = #tpu.core_type<tc>, window_params = [{transform_indices = @transform_0, window_bounds = array<i64: 4, 16, 16>}, {transform_indices = @transform_1, window_bounds = array<i64: 4, 16, 16>}, {pipeline_mode = #tpu.pipeline_mode<synchronous>, transform_indices = @transform_2, window_bounds = array<i64: 16, 16>}, {pipeline_mode = #tpu.pipeline_mode<synchronous>, transform_indices = @transform_3, window_bounds = array<i64: 16, 16>}, {transform_indices = @transform_4, window_bounds = array<i64: 1, 8, 128>}]} {
    %c0 = arith.constant 0 : index
    %c0_0 = arith.constant 0 : index
    %c0_1 = arith.constant 0 : index
    %0 = vector.load %arg1[%c0, %c0_0, %c0_1] : memref<4x16x16xf32, #tpu.memory_space<vmem>>, vector<4x16x16xf32>
    %c0_2 = arith.constant 0 : index
    %c0_3 = arith.constant 0 : index
    %c0_4 = arith.constant 0 : index
    %1 = vector.load %arg2[%c0_2, %c0_3, %c0_4] : memref<4x16x16xf32, #tpu.memory_space<vmem>>, vector<4x16x16xf32>
    %c0_5 = arith.constant 0 : index
    %c0_6 = arith.constant 0 : index
    %2 = vector.load %arg3[%c0_5, %c0_6] : memref<16x16xbf16, #tpu.memory_space<vmem>>, vector<16x16xbf16>
    %c0_7 = arith.constant 0 : index
    %c0_8 = arith.constant 0 : index
    %3 = vector.load %arg4[%c0_7, %c0_8] : memref<16x16xbf16, #tpu.memory_space<vmem>>, vector<16x16xbf16>
    %4 = arith.mulf %0, %0 : vector<4x16x16xf32>
    %5 = arith.mulf %1, %1 : vector<4x16x16xf32>
    %6 = arith.mulf %0, %1 : vector<4x16x16xf32>
    %7 = arith.truncf %0 : vector<4x16x16xf32> to vector<4x16x16xbf16>
    %8 = arith.truncf %1 : vector<4x16x16xf32> to vector<4x16x16xbf16>
    %9 = arith.truncf %4 : vector<4x16x16xf32> to vector<4x16x16xbf16>
    %10 = arith.truncf %5 : vector<4x16x16xf32> to vector<4x16x16xbf16>
    %11 = arith.truncf %6 : vector<4x16x16xf32> to vector<4x16x16xbf16>
    %12 = tpu.concatenate %7, %8, %9, %10, %11 in 0 : vector<4x16x16xbf16>, vector<4x16x16xbf16>, vector<4x16x16xbf16>, vector<4x16x16xbf16>, vector<4x16x16xbf16> -> vector<20x16x16xbf16>
    %13 = vector.shape_cast %12 : vector<20x16x16xbf16> to vector<320x16xbf16>
    %cst = arith.constant dense<0.000000e+00> : vector<320x16xf32>
    %14 = tpu.matmul %13, %2, %cst {dimension_numbers = #tpu.dot_dimension_numbers<[1], [0], [0], [1], [0, 0, 1, 1], [], []>} : vector<320x16xbf16>, vector<16x16xbf16>, vector<320x16xf32> -> vector<320x16xf32>
    %15 = vector.shape_cast %14 : vector<320x16xf32> to vector<20x16x16xf32>
    %16 = tpu.transpose %15, [0, 2, 1] : vector<20x16x16xf32> -> vector<20x16x16xf32>
    %17 = arith.truncf %16 : vector<20x16x16xf32> to vector<20x16x16xbf16>
    %18 = vector.shape_cast %17 : vector<20x16x16xbf16> to vector<320x16xbf16>
    %cst_9 = arith.constant dense<0.000000e+00> : vector<320x16xf32>
    %19 = tpu.matmul %18, %3, %cst_9 {dimension_numbers = #tpu.dot_dimension_numbers<[1], [0], [0], [1], [0, 0, 1, 1], [], []>} : vector<320x16xbf16>, vector<16x16xbf16>, vector<320x16xf32> -> vector<320x16xf32>
    %20 = vector.shape_cast %19 : vector<320x16xf32> to vector<20x16x16xf32>
    %21 = vector.extract_strided_slice %20 {offsets = [0, 0, 0], sizes = [4, 16, 16], strides = [1, 1, 1]} : vector<20x16x16xf32> to vector<4x16x16xf32>
    %22 = vector.extract_strided_slice %20 {offsets = [4, 0, 0], sizes = [4, 16, 16], strides = [1, 1, 1]} : vector<20x16x16xf32> to vector<4x16x16xf32>
    %23 = vector.extract_strided_slice %20 {offsets = [8, 0, 0], sizes = [4, 16, 16], strides = [1, 1, 1]} : vector<20x16x16xf32> to vector<4x16x16xf32>
    %24 = vector.extract_strided_slice %20 {offsets = [12, 0, 0], sizes = [4, 16, 16], strides = [1, 1, 1]} : vector<20x16x16xf32> to vector<4x16x16xf32>
    %25 = vector.extract_strided_slice %20 {offsets = [16, 0, 0], sizes = [4, 16, 16], strides = [1, 1, 1]} : vector<20x16x16xf32> to vector<4x16x16xf32>
    %26 = arith.mulf %21, %21 : vector<4x16x16xf32>
    %27 = arith.mulf %22, %22 : vector<4x16x16xf32>
    %28 = arith.mulf %21, %22 : vector<4x16x16xf32>
    %29 = arith.subf %23, %26 : vector<4x16x16xf32>
    %30 = arith.subf %24, %27 : vector<4x16x16xf32>
    %31 = arith.subf %25, %28 : vector<4x16x16xf32>
    %cst_10 = arith.constant 2.000000e+00 : f32
    %32 = vector.broadcast %cst_10 : f32 to vector<4x16x16xf32>
    %33 = arith.mulf %32, %28 : vector<4x16x16xf32>
    %cst_11 = arith.constant 9.99999974E-5 : f32
    %34 = vector.broadcast %cst_11 : f32 to vector<4x16x16xf32>
    %35 = arith.addf %33, %34 : vector<4x16x16xf32>
    %cst_12 = arith.constant 2.000000e+00 : f32
    %36 = vector.broadcast %cst_12 : f32 to vector<4x16x16xf32>
    %37 = arith.mulf %36, %31 : vector<4x16x16xf32>
    %cst_13 = arith.constant 8.99999984E-4 : f32
    %38 = vector.broadcast %cst_13 : f32 to vector<4x16x16xf32>
    %39 = arith.addf %37, %38 : vector<4x16x16xf32>
    %40 = arith.mulf %35, %39 : vector<4x16x16xf32>
    %41 = arith.addf %26, %27 : vector<4x16x16xf32>
    %cst_14 = arith.constant 9.99999974E-5 : f32
    %42 = vector.broadcast %cst_14 : f32 to vector<4x16x16xf32>
    %43 = arith.addf %41, %42 : vector<4x16x16xf32>
    %44 = arith.addf %29, %30 : vector<4x16x16xf32>
    %cst_15 = arith.constant 8.99999984E-4 : f32
    %45 = vector.broadcast %cst_15 : f32 to vector<4x16x16xf32>
    %46 = arith.addf %44, %45 : vector<4x16x16xf32>
    %47 = arith.mulf %43, %46 : vector<4x16x16xf32>
    %48 = tpu.reciprocal %47 {approx = true} : vector<4x16x16xf32> -> vector<4x16x16xf32>
    %49 = arith.mulf %40, %48 : vector<4x16x16xf32>
    %50 = arith.subf %0, %1 : vector<4x16x16xf32>
    %51 = arith.mulf %50, %50 : vector<4x16x16xf32>
    %c1_i32 = arith.constant 1 : i32
    %52 = arith.cmpi ne, %arg0, %c1_i32 : i32
    %53 = arith.extui %52 : i1 to i32
    %c0_i32 = arith.constant 0 : i32
    %54 = arith.cmpi ne, %53, %c0_i32 : i32
    scf.if %54 {
      %58 = vector.shape_cast %49 : vector<4x16x16xf32> to vector<1x4x16x16xf32>
      %cst_18 = arith.constant dense<0.000000e+00> : vector<1xf32>
      %59 = vector.multi_reduction <add>, %58, %cst_18 [1, 2, 3] : vector<1x4x16x16xf32> to vector<1xf32>
      %60 = vector.shape_cast %59 : vector<1xf32> to vector<1x1x1x1xf32>
      %61 = vector.extract %60[0, 0, 0, 0] : f32 from vector<1x1x1x1xf32>
      %62 = vector.shape_cast %51 : vector<4x16x16xf32> to vector<1x4x16x16xf32>
      %cst_19 = arith.constant dense<0.000000e+00> : vector<1xf32>
      %63 = vector.multi_reduction <add>, %62, %cst_19 [1, 2, 3] : vector<1x4x16x16xf32> to vector<1xf32>
      %64 = vector.shape_cast %63 : vector<1xf32> to vector<1x1x1x1xf32>
      %65 = vector.extract %64[0, 0, 0, 0] : f32 from vector<1x1x1x1xf32>
      %66 = tpu.iota {dimensions = array<i32: 0>} : vector<8x128xi32>
      %c0_i32_20 = arith.constant 0 : i32
      %67 = vector.broadcast %c0_i32_20 : i32 to vector<8x128xi32>
      %68 = arith.cmpi eq, %66, %67 : vector<8x128xi32>
      %c1_i32_21 = arith.constant 1 : i32
      %69 = vector.broadcast %c1_i32_21 : i32 to vector<8x128xi32>
      %70 = arith.cmpi eq, %66, %69 : vector<8x128xi32>
      %cst_22 = arith.constant 0.000000e+00 : f32
      %71 = vector.broadcast %65 : f32 to vector<8x128xf32>
      %72 = vector.broadcast %cst_22 : f32 to vector<8x128xf32>
      %73 = arith.select %70, %71, %72 : vector<8x128xi1>, vector<8x128xf32>
      %74 = vector.broadcast %61 : f32 to vector<8x128xf32>
      %75 = arith.select %68, %74, %73 : vector<8x128xi1>, vector<8x128xf32>
      %c0_23 = arith.constant 0 : index
      %c0_24 = arith.constant 0 : index
      %c0_25 = arith.constant 0 : index
      %76 = vector.load %arg5[%c0_23, %c0_24, %c0_25] : memref<1x8x128xf32, #tpu.memory_space<vmem>>, vector<1x8x128xf32>
      %77 = vector.shape_cast %76 : vector<1x8x128xf32> to vector<8x128xf32>
      %78 = vector.shape_cast %75 : vector<8x128xf32> to vector<1x8x128xf32>
      tpu.vector_store %arg5[%c0_23, %c0_24, %c0_25], %78 {strides = array<i32>} : memref<1x8x128xf32, #tpu.memory_space<vmem>>, vector<1x8x128xf32>,
    } else {
    }
    %c1_i32_16 = arith.constant 1 : i32
    %55 = arith.cmpi eq, %arg0, %c1_i32_16 : i32
    %56 = arith.extui %55 : i1 to i32
    %c0_i32_17 = arith.constant 0 : i32
    %57 = arith.cmpi ne, %56, %c0_i32_17 : i32
    scf.if %57 {
      %c4_i32 = arith.constant 4 : i32
      %58 = arith.muli %arg0, %c4_i32 : i32
      %59 = tpu.iota {dimensions = array<i32: 0>} : vector<4x16x16xi32>
      %60 = vector.broadcast %58 : i32 to vector<4x16x16xi32>
      %61 = arith.addi %60, %59 : vector<4x16x16xi32>
      %c6_i32 = arith.constant 6 : i32
      %62 = vector.broadcast %c6_i32 : i32 to vector<4x16x16xi32>
      %63 = arith.cmpi slt, %61, %62 : vector<4x16x16xi32>
      %64 = tpu.iota {dimensions = array<i32: 0>} : vector<4x16x16xi32>
      %65 = vector.broadcast %58 : i32 to vector<4x16x16xi32>
      %66 = arith.addi %65, %64 : vector<4x16x16xi32>
      %c6_i32_18 = arith.constant 6 : i32
      %67 = vector.broadcast %c6_i32_18 : i32 to vector<4x16x16xi32>
      %68 = arith.cmpi slt, %66, %67 : vector<4x16x16xi32>
      %cst_19 = arith.constant 0.000000e+00 : f32
      %69 = vector.broadcast %cst_19 : f32 to vector<4x16x16xf32>
      %70 = arith.select %63, %49, %69 : vector<4x16x16xi1>, vector<4x16x16xf32>
      %71 = vector.shape_cast %70 : vector<4x16x16xf32> to vector<1x4x16x16xf32>
      %cst_20 = arith.constant dense<0.000000e+00> : vector<1xf32>
      %72 = vector.multi_reduction <add>, %71, %cst_20 [1, 2, 3] : vector<1x4x16x16xf32> to vector<1xf32>
      %73 = vector.shape_cast %72 : vector<1xf32> to vector<1x1x1x1xf32>
      %74 = vector.extract %73[0, 0, 0, 0] : f32 from vector<1x1x1x1xf32>
      %cst_21 = arith.constant 0.000000e+00 : f32
      %75 = vector.broadcast %cst_21 : f32 to vector<4x16x16xf32>
      %76 = arith.select %68, %51, %75 : vector<4x16x16xi1>, vector<4x16x16xf32>
      %77 = vector.shape_cast %76 : vector<4x16x16xf32> to vector<1x4x16x16xf32>
      %cst_22 = arith.constant dense<0.000000e+00> : vector<1xf32>
      %78 = vector.multi_reduction <add>, %77, %cst_22 [1, 2, 3] : vector<1x4x16x16xf32> to vector<1xf32>
      %79 = vector.shape_cast %78 : vector<1xf32> to vector<1x1x1x1xf32>
      %80 = vector.extract %79[0, 0, 0, 0] : f32 from vector<1x1x1x1xf32>
      %81 = tpu.iota {dimensions = array<i32: 0>} : vector<8x128xi32>
      %c0_i32_23 = arith.constant 0 : i32
      %82 = vector.broadcast %c0_i32_23 : i32 to vector<8x128xi32>
      %83 = arith.cmpi eq, %81, %82 : vector<8x128xi32>
      %c1_i32_24 = arith.constant 1 : i32
      %84 = vector.broadcast %c1_i32_24 : i32 to vector<8x128xi32>
      %85 = arith.cmpi eq, %81, %84 : vector<8x128xi32>
      %cst_25 = arith.constant 0.000000e+00 : f32
      %86 = vector.broadcast %80 : f32 to vector<8x128xf32>
      %87 = vector.broadcast %cst_25 : f32 to vector<8x128xf32>
      %88 = arith.select %85, %86, %87 : vector<8x128xi1>, vector<8x128xf32>
      %89 = vector.broadcast %74 : f32 to vector<8x128xf32>
      %90 = arith.select %83, %89, %88 : vector<8x128xi1>, vector<8x128xf32>
      %c0_26 = arith.constant 0 : index
      %c0_27 = arith.constant 0 : index
      %c0_28 = arith.constant 0 : index
      %91 = vector.load %arg5[%c0_26, %c0_27, %c0_28] : memref<1x8x128xf32, #tpu.memory_space<vmem>>, vector<1x8x128xf32>
      %92 = vector.shape_cast %91 : vector<1x8x128xf32> to vector<8x128xf32>
      %93 = vector.shape_cast %90 : vector<8x128xf32> to vector<1x8x128xf32>
      tpu.vector_store %arg5[%c0_26, %c0_27, %c0_28], %93 {strides = array<i32>} : memref<1x8x128xf32, #tpu.memory_space<vmem>>, vector<1x8x128xf32>,
    } else {
    }
    return
  }
  func.func @transform_0(%arg0: i32) -> (i32, i32, i32) {
    %c0_i32 = arith.constant 0 : i32
    %c0_i32_0 = arith.constant 0 : i32
    %c0_i32_1 = arith.constant 0 : i32
    return %arg0, %c0_i32, %c0_i32_0 : i32, i32, i32
  }
  func.func @transform_1(%arg0: i32) -> (i32, i32, i32) {
    %c0_i32 = arith.constant 0 : i32
    %c0_i32_0 = arith.constant 0 : i32
    %c0_i32_1 = arith.constant 0 : i32
    return %arg0, %c0_i32, %c0_i32_0 : i32, i32, i32
  }
  func.func @transform_2(%arg0: i32) -> (i32, i32) {
    %c0_i32 = arith.constant 0 : i32
    %c0_i32_0 = arith.constant 0 : i32
    %c0_i32_1 = arith.constant 0 : i32
    return %c0_i32, %c0_i32_0 : i32, i32
  }
  func.func @transform_3(%arg0: i32) -> (i32, i32) {
    %c0_i32 = arith.constant 0 : i32
    %c0_i32_0 = arith.constant 0 : i32
    %c0_i32_1 = arith.constant 0 : i32
    return %c0_i32, %c0_i32_0 : i32, i32
  }
  func.func @transform_4(%arg0: i32) -> (i32, i32, i32) {
    %c0_i32 = arith.constant 0 : i32
    %c0_i32_0 = arith.constant 0 : i32
    %c0_i32_1 = arith.constant 0 : i32
    return %arg0, %c0_i32, %c0_i32_0 : i32, i32, i32
  }
}

</mosaic_0001>

<bundles_post_ra>
// kernel: tpu_custom_call.1
= control target key start
LH: loop header
LB: loop body
LE: loop exit
PB: predicated region body
PF: predicated region fallthrough
CT: control target
= control target key end

     0   :  { %9 = vsyncpa [#allocation3], 0  ;;  %s3200_s0 = inlined_call_operand.hbm [shape: f32[6,16,16], index: 0, kind: input, shape index: {}]   ;;  %s3201_s1 = inlined_call_operand.hbm [shape: f32[6,16,16], index: 1, kind: input, shape index: {}]   ;;  %s3202_s2 = inlined_call_operand.hbm [shape: bf16[16,16], index: 2, kind: input, shape index: {}]   ;;  %s3203_s3 = inlined_call_operand.vmem [shape: bf16[16,16], index: 3, kind: input, shape index: {}]   ;;  %s3204_s4 = inlined_call_operand.hbm [shape: f32[2,8,128], index: 4, kind: output, shape index: {}]  }
   0x1   :  { %11 = vsyncpa [#allocation3 + $0x1], 0 }
   0x2   :  { %12 = vsyncpa [#allocation6], 0 }
   0x3   :  { %14 = vsyncpa [#allocation6 + $0x1], 0 }
   0x4   :  { %15 = vsyncpa [#allocation4], 0 }
   0x5   :  { %17 = vsyncpa [#allocation4 + $0x1], 0  ;;  %s2601_s15 = smov 0   ;;  %s2603_s16 = smov 0  }
   0x6   :  { %s2605_s17 = smov 0   ;;  %s2607_s18 = smov 0  }
   0x7 LB: > { %s2622_s19 = sadd.s32 4294967295, %s2564_s18   ;;  %s1967_s20 = sadd.s32 4294967294, %s2564_s18   ;;  %s2564_s18 = sphi %s2607_s18, %s3228_s18   ;;  %s2560_s17 = sphi %s2605_s17, %s3227_s17   ;;  %s2556_s16 = sphi %s2603_s16, %s3226_s16   ;;  %s2552_s15 = sphi %s2601_s15, %s3225_s15  }
   0x8   : > { %s2626_s21 = sadd.s32 1, %s2564_s18   ;;  %s30_s22 = sadd.s32 1, %s2560_s17 }
   0x9   : > { %s27_s23 = ssub.s32 %s2564_s18, %s2626_s21  ;;  %p37_p0 = scmp.ne.s32.totalorder %s2560_s17, %s2556_s16 }
   0xa   : > { %p28_p1 = scmp.eq.s32.totalorder %s27_s23, 0  ;;  %p38_p2 = scmp.eq.s32.totalorder %s2564_s18, 0 }
   0xb   : > { %p43_p3 = scmp.ne.s32.totalorder %s2556_s16, %s2552_s15  ;;  %p3206_p4 = scmp.eq.s32.totalorder %s2622_s19, 0 }
   0xc   : > { %s2638_s24 = scalar_select %p28_p1, %s2560_s17, %s30_s22  }
   0xd   : > { %p2640_p5 = por %p38_p2, %p37_p0  ;;  %p2646_p6 = por %p3206_p4, %p43_p3 }
   0xe   : > { %p3205_p7 = scmp.eq.s32.totalorder %s2622_s19, 1  ;;  %p141_p8 = scmp.eq.s32.totalorder %s1967_s20, 1 }
   0xf   : > { %s3210_s25 = scalar_select %p2640_p5, 1, 0 }
  0x10   : > { %s3211_s26 = scalar_select %p2646_p6, 1, 0 }
  0x11   : > { %p1968_p9 = scmp.ge.s32.totalorder %s2564_s18, 1  ;;  %p148_p10 = scmp.lt.s32.totalorder %s2564_s18, 3 }
  0x12   : > { %p2655_p11 = por %p3205_p7, %p37_p0  ;;  %p2659_p12 = por %p141_p8, %p43_p3 }
  0x13   : > { %p2663_p13 = pnand %p1968_p9, %p148_p10  ;;  %s2566_s30 = smov [#allocation7]  }
  0x14   : > { %s3212_s27 = scalar_select %p2655_p11, 1, 0 }
  0x15   : > { %s3213_s28 = scalar_select %p2659_p12, 1, 0 }
  0x16   : > { %s3214_s29 = scalar_select %p2663_p13, 1, 0 }
  0x17   : > { %p2197_p1 = pneg %p2663_p13  ;;  %s160_s5 = sshll.u32 %s2566_s30, 4  ;;  %s161_s5 = int_to_ptr.vmem [resolvable:$true] %s160_s5 }
  0x18   : > { %s2406_s9 = scalar_lea.hbm %s3202_s2, 128 }
  0x19   : > { %p2671_p2 = pnand %p2197_p1, %p3206_p4  ;;  %p2407_p0 = scmp.ne.s32.totalorder %s3202_s2, %s2406_s9 }
  0x1a   : > { %p2413_p10 = scmp.lt.u32.totalorder %s2406_s9, %s3202_s2 }
  0x1b   : > { %p2408_p3 = pneg %p2671_p2 }
  0x1d   : > { %p2409_p8 = pnand %p2408_p3, %p2407_p0 }
  0x1f   : > { %p2410_p9 = pneg %p2409_p8 }
  0x21   : > { %p2415_p1 = pnand %p2413_p10, %p2410_p9 }
  0x23   : > { %2418 = shalt.err (!%p2415_p1)
}
  0x24   : > { %s2419_s14 = scalar_lea.vmem %s161_s5, 128  ;;  %p2427_p11 = scmp.lt.s32.totalorder %s161_s5, %s161_s5 }
  0x25   : > { %p2420_p7 = scmp.ne.s32.totalorder %s161_s5, %s2419_s14  ;;  %p2428_p6 = scmp.lt.s32.totalorder %s2419_s14, %s2419_s14 }
  0x27   : > { %p2422_p4 = pnand %p2420_p7, %p2408_p3  ;;  %p2429_p13 = por %p2428_p6, %p2427_p11 }
  0x29   : > { %p2423_p12 = pneg %p2422_p4 }
  0x2b   : > { %p2430_p5 = pnand %p2429_p13, %p2423_p12 }
  0x2d   : > { %2433 = shalt.err (!%p2430_p5)
}
  0x2e   : > { %s2567_s20 = smov 64   ;;  %s2568_s22 = smov 4  }
  0x2f   : > { %2200 = dma.hbm_to_vmem [thread:$0]  (!%p2671_p2), %s3202_s2, 128, %s161_s5, [#allocation6], %s2567_s20, %s2567_s20, %s2568_s22  }
  0x30   : > { %p1970_p0 = scmp.ge.s32.totalorder %s2564_s18, 2 }
  0x31   : > { %p3216_p4 = scmp.ne.s32.totalorder (!%p1970_p0), %s3210_s25, 0 }
  0x32   : > { %173 = sbr.rel (%p1970_p0) target bundleno = 129 (0x81), region = 24 }
  0x39   : > { %176 = sbr.rel (!%p3216_p4) target bundleno = 92 (0x5c), region = 28  ;;  %s177_s7 = sand.u32 (%p3216_p4), 1, %s2560_s17  }
  0x3a   : > { %s1972_s8 = sshll.u32 (%p3216_p4), %s2564_s18, 2  ;;  %s1971_s9 = sshll.u32 (%p3216_p4), %s177_s7, 6 }
  0x3b   : > { %s183_s10 = ssub.s32 (%p3216_p4), 6, %s1972_s8  ;;  %s2701_s11 = scalar_lea.sflag (%p3216_p4), [#allocation3], %s177_s7 }
  0x3c   : > { %p184_p5 = scmp.lt.s32.totalorder (%p3216_p4), %s183_s10, 4  ;;  %s181_s12 = scalar_lea.vmem (%p3216_p4), [#allocation2], %s1971_s9 }
  0x40   : > { %s3230_s10 = smov (!%p184_p5, %s183_s10), 4 }
  0x41   : > { %s2698_s6 = sshll.u32 %s3230_s10, 8 }
  0x42   : > { %s189_s5 = ssub.s32 1024, %s2698_s6 }
  0x43   : > { %190 = vsyncadd %s2701_s11, %s189_s5  ;;  %p1975_p6 = scmp.ne.s32.totalorder %s2698_s6, 0  ;;  %s2047_s13 = sshll.u32 %s2564_s18, 10 }
  0x44   : > { %s2709_s22 = scalar_lea.hbm %s3200_s0, %s2047_s13  ;;  %s197_s23 = sshll.u32 %s181_s12, 4  ;;  %s2711_s23 = int_to_ptr.vmem [resolvable:$true] %s197_s23 }
  0x45   : > { %s2434_s30 = scalar_lea.hbm %s2709_s22, %s2698_s6  ;;  %s2438_s9 = scalar_lea.hbm %s3200_s0, 1536 }
  0x46   : > { %p2435_p7 = scmp.ne.s32.totalorder %s2709_s22, %s2434_s30  ;;  %p2439_p13 = scmp.lt.u32.totalorder %s2709_s22, %s3200_s0 }
  0x47   : > { %p2440_p2 = scmp.lt.u32.totalorder %s2438_s9, %s2434_s30  ;;  %p2442_p8 = scmp.lt.u32.totalorder %s2434_s30, %s2709_s22 }
  0x48   : > { %p2436_p11 = pnand %p2435_p7, %p1975_p6 }
  0x49   : > { %p2441_p3 = por %p2440_p2, %p2439_p13 }
  0x4a   : > { %p2437_p12 = pneg %p2436_p11 }
  0x4b   : > { %p2443_p9 = por %p2442_p8, %p2441_p3 }
  0x4d   : > { %p2444_p10 = pnand %p2443_p9, %p2437_p12 }
  0x4f   : > { %2447 = shalt.err (!%p2444_p10)
}
  0x50   : > { %s2448_s12 = scalar_lea.vmem %s2711_s23, %s2698_s6  ;;  %s2569_s13 = smov [#allocation2]  }
  0x51   : > { %p2449_p1 = scmp.ne.s32.totalorder %s2711_s23, %s2448_s12  ;;  %s2452_s14 = sshll.u32 %s2569_s13, 4  ;;  %s2453_s14 = int_to_ptr.vmem [resolvable:$false] %s2452_s14 }
  0x52   : > { %s2454_s20 = scalar_lea.vmem %s2453_s14, 2048  ;;  %p2455_p7 = scmp.lt.s32.totalorder %s2711_s23, %s2453_s14 }
  0x53   : > { %p2450_p4 = pnand %p2449_p1, %p1975_p6  ;;  %p2456_p11 = scmp.lt.s32.totalorder %s2454_s20, %s2448_s12 }
  0x55   : > { %p2451_p5 = pneg %p2450_p4  ;;  %p2457_p13 = por %p2456_p11, %p2455_p7 }
  0x57   : > { %p2458_p2 = pnand %p2457_p13, %p2451_p5 }
  0x59   : > { %2461 = shalt.err (!%p2458_p2)
}
  0x5a   : > { %s2570_s30 = smov 128   ;;  %s2571_s7 = smov 8  }
  0x5b   : > { %203 = dma.hbm_to_vmem [thread:$0]  (%p1975_p6), %s2709_s22, %s2698_s6, %s2711_s23, %s2701_s11, %s2570_s30, %s2570_s30, %s2571_s7  }
  0x5c PF: > { %p3217_p12 = scmp.ne.s32.totalorder %s3210_s25, 0 }
  0x5d   : > { %s207_s8 = sand.u32 (%p3217_p12), 1, %s2564_s18   ;;  %s209_s9 = sand.u32 (%p3217_p12), 1, %s2560_s17  }
  0x5e   : > { %206 = sbr.rel (!%p3217_p12) target bundleno = 129 (0x81), region = 32  ;;  %s1981_s10 = sshll.u32 (%p3217_p12), %s209_s9, 6 }
  0x5f   : > { %s1982_s5 = sshll.u32 (%p3217_p12), %s2564_s18, 2  ;;  %s2746_s20 = scalar_lea.sflag (%p3217_p12), [#allocation6], %s207_s8 }
  0x60   : > { %s213_s12 = ssub.s32 (%p3217_p12), 6, %s1982_s5  ;;  %s211_s6 = scalar_lea.vmem (%p3217_p12), [#allocation5], %s1981_s10 }
  0x61   : > { %p214_p3 = scmp.lt.s32.totalorder (%p3217_p12), %s213_s12, 4 }
  0x65   : > { %s3232_s12 = smov (!%p214_p3, %s213_s12), 4 }
  0x66   : > { %s2743_s13 = sshll.u32 %s3232_s12, 8 }
  0x67   : > { %s219_s14 = ssub.s32 1024, %s2743_s13 }
  0x68   : > { %220 = vsyncadd %s2746_s20, %s219_s14  ;;  %p1985_p6 = scmp.ne.s32.totalorder %s2743_s13, 0  ;;  %s2052_s25 = sshll.u32 %s2564_s18, 10 }
  0x69   : > { %s2754_s23 = scalar_lea.hbm %s3201_s1, %s2052_s25  ;;  %s227_s30 = sshll.u32 %s211_s6, 4  ;;  %s2756_s30 = int_to_ptr.vmem [resolvable:$true] %s227_s30 }
  0x6a   : > { %s2462_s7 = scalar_lea.hbm %s2754_s23, %s2743_s13  ;;  %s2466_s10 = scalar_lea.hbm %s3201_s1, 1536 }
  0x6b   : > { %p2463_p8 = scmp.ne.s32.totalorder %s2754_s23, %s2462_s7  ;;  %p2467_p1 = scmp.lt.u32.totalorder %s2754_s23, %s3201_s1 }
  0x6c   : > { %p2468_p4 = scmp.lt.u32.totalorder %s2466_s10, %s2462_s7  ;;  %p2470_p7 = scmp.lt.u32.totalorder %s2462_s7, %s2754_s23 }
  0x6d   : > { %p2464_p9 = pnand %p2463_p8, %p1985_p6 }
  0x6e   : > { %p2469_p5 = por %p2468_p4, %p2467_p1 }
  0x6f   : > { %p2465_p10 = pneg %p2464_p9 }
  0x70   : > { %p2471_p11 = por %p2470_p7, %p2469_p5 }
  0x72   : > { %p2472_p13 = pnand %p2471_p11, %p2465_p10 }
  0x74   : > { %2475 = shalt.err (!%p2472_p13)
}
  0x75   : > { %s2476_s14 = scalar_lea.vmem %s2756_s30, %s2743_s13  ;;  %s2572_s6 = smov [#allocation5]  }
  0x76   : > { %p2477_p2 = scmp.ne.s32.totalorder %s2756_s30, %s2476_s14  ;;  %s2480_s25 = sshll.u32 %s2572_s6, 4  ;;  %s2481_s25 = int_to_ptr.vmem [resolvable:$false] %s2480_s25 }
  0x77   : > { %s2482_s11 = scalar_lea.vmem %s2481_s25, 2048  ;;  %p2483_p8 = scmp.lt.s32.totalorder %s2756_s30, %s2481_s25 }
  0x78   : > { %p2478_p12 = pnand %p2477_p2, %p1985_p6  ;;  %p2484_p9 = scmp.lt.s32.totalorder %s2482_s11, %s2476_s14 }
  0x7a   : > { %p2479_p3 = pneg %p2478_p12  ;;  %p2485_p1 = por %p2484_p9, %p2483_p8 }
  0x7c   : > { %p2486_p4 = pnand %p2485_p1, %p2479_p3 }
  0x7e   : > { %2489 = shalt.err (!%p2486_p4)
}
  0x7f   : > { %s2573_s22 = smov 128   ;;  %s2574_s7 = smov 8  }
  0x80   : > { %233 = dma.hbm_to_vmem [thread:$0]  (%p1985_p6), %s2754_s23, %s2743_s13, %s2756_s30, %s2746_s20, %s2573_s22, %s2573_s22, %s2574_s7  }
  0x81 PF: > { %p3218_p10 = scmp.ne.s32.totalorder %s3214_s29, 0 }
  0x82   : > { %s2786_s8 = sand.u32 (!%p3218_p10), 1, %s2556_s16   ;;  %p3219_p5 = scmp.ne.s32.totalorder (!%p3218_p10), %s3211_s26, 0 }
  0x83   : > { %239 = sbr.rel (%p3218_p10) target bundleno = 1276 (0x4fc), region = 36  ;;  %s1992_s9 = sshll.u32 (!%p3218_p10), %s2786_s8, 6 }
  0x84   : > { %s242_s10 = scalar_lea.sflag (!%p3218_p10), [#allocation3], %s2786_s8  ;;  %s2790_s5 = scalar_lea.vmem (!%p3218_p10), [#allocation2], %s1992_s9 }
  0x8a   : > { %2535 = dma.done.wait (%p3219_p5), %s242_s10, 1024  }
  0x8b   : > { %2537 = vsyncadd (%p3219_p5), %s242_s10, 4294966272  ;;  %s250_s13 = sand.u32 1, %s2622_s19   ;;  %s2797_s20 = scalar_lea.vmem [#allocation5], %s1992_s9 }
  0x8c   : > { %s251_s29 = scalar_lea.sflag [#allocation6], %s250_s13 }
  0x8d   : > { %2539 = dma.done.wait (%p3219_p5), %s251_s29, 1024  }
  0x8e   : > { %2541 = vsyncadd (%p3219_p5), %s251_s29, 4294966272  ;;  %p3220_p6 = scmp.eq.s32.totalorder %s2622_s19, 0 }
  0x90   : > { %2543 = dma.done.wait (%p3220_p6), [#allocation6], 128   ;;  %p3221_p7 = pmov %p3220_p6 }
  0x91   : > { %s1995_s23 = sshll.u32 %s2786_s8, 3  ;;  %v2388_v0 = vld [vmem:[#allocation7] sm:$0xff]   ;;  %v2812_v2 = vld [vmem:[%s2790_s5 + $0x8] sm:$0xff]  ;;  %vm371_vm0 = vcmask 130048   ;;  %v2825_v7 = vld [vmem:[%s2790_s5 + $0x10] sm:$0xff]  ;;  %p3222_p11 = scmp.eq.s32.totalorder %s2622_s19, 1 }
  0x92   : > { %2545 = vsyncadd (%p3221_p7), [#allocation6], 4294967168  ;;  %v2809_v1 = vld [vmem:[%s2790_s5] sm:$0xff]  ;;  %2097 = vmatprep.subr.bf16.mxu0 %v2388_v0  ;;  %v2818_v4 = vld [vmem:[%s2797_s20 + $0x8] sm:$0xff]  ;;  %v322_v41 = vmul.f32 %v2812_v2, %v2812_v2  ;;  %v323_v44 = vmul.f32 %v2825_v7, %v2825_v7  ;;  %s3073_s12 = scalar_lea.vmem [#allocation8], %s1995_s23 }
  0x93   : > { %v2815_v3 = vld [vmem:[%s2797_s20] sm:$0xff]  ;;  %v345_v5 = vpack.c.bf16 %v2812_v2, %v2809_v1  ;;  %v2828_v8 = vld [vmem:[%s2790_s5 + $0x18] sm:$0xff]  ;;  %2098 = vmatpush3.bf16.msra.mxu0 %v2388_v0  ;;  %v1689_v9 = vsub.f32 %v2812_v2, %v2818_v4  ;;  %v2838_v12 = vld [vmem:[%s2790_s5 + $0x28] sm:$0xff]  ;;  %v321_v40 = vmul.f32 %v2809_v1, %v2809_v1  ;;  %v330_v53 = vmul.f32 %v2818_v4, %v2818_v4 }
  0x94   : > { %v1688_v6 = vsub.f32 %v2809_v1, %v2815_v3  ;;  %v346_v10 = vpack.c.bf16 %v2828_v8, %v2825_v7  ;;  %v2835_v11 = vld [vmem:[%s2790_s5 + $0x20] sm:$0xff]  ;;  %v2846_v15 = vld [vmem:[%s2790_s5 + $0x30] sm:$0xff]  ;;  %v2849_v16 = vld [vmem:[%s2790_s5 + $0x38] sm:$0xff]  ;;  %v349_v37 = vpack.c.bf16 %v2818_v4, %v2815_v3  ;;  %v324_v45 = vmul.f32 %v2828_v8, %v2828_v8 }
  0x95   : > { %2099 = vmatprep.mubr.msk.bf16.mxu0 %vm371_vm0, %v345_v5  ;;  %v347_v14 = vpack.c.bf16 %v2838_v12, %v2835_v11  ;;  %v2852_v17 = vld [vmem:[%s2797_s20 + $0x10] sm:$0xff]  ;;  %v2855_v18 = vld [vmem:[%s2797_s20 + $0x18] sm:$0xff]  ;;  %v2857_v19 = vmul.f32 %v1689_v9, %v1689_v9  ;;  %v2862_v21 = vld [vmem:[%s2797_s20 + $0x20] sm:$0xff]  ;;  %v348_v36 = vpack.c.bf16 %v2849_v16, %v2846_v15  ;;  %v353_v43 = vpack.c.bf16 %v322_v41, %v321_v40 }
  0x96   : > { %v2841_v13 = vmul.f32 %v1688_v6, %v1688_v6  ;;  %v1690_v20 = vsub.f32 %v2825_v7, %v2852_v17  ;;  %v2865_v22 = vld [vmem:[%s2797_s20 + $0x28] sm:$0xff]  ;;  %v2868_v23 = vld [vmem:[%s2797_s20 + $0x30] sm:$0xff]  ;;  %2100 = vmatmul.mubr.msk.bf16.vlgmr.msra.gmra.mrb[0].mxu0 %vm371_vm0, %v346_v10  ;;  %v1691_v24 = vsub.f32 %v2828_v8, %v2855_v18  ;;  %v1692_v25 = vsub.f32 %v2835_v11, %v2862_v21  ;;  %v2878_v27 = vld [vmem:[%s2797_s20 + $0x38] sm:$0xff] }
  0x97   : > { %v1693_v26 = vsub.f32 %v2838_v12, %v2865_v22  ;;  %2103 = vmatprep.mubr.msk.bf16.mxu0 %vm371_vm0, %v347_v14  ;;  %v1694_v29 = vsub.f32 %v2846_v15, %v2868_v23  ;;  %v1695_v30 = vsub.f32 %v2849_v16, %v2878_v27  ;;  %v350_v38 = vpack.c.bf16 %v2855_v18, %v2852_v17 }
  0x98   : > { %v2881_v28 = vmul.f32 %v1690_v20, %v1690_v20  ;;  %v2887_v31 = vmul.f32 %v1691_v24, %v1691_v24  ;;  %v2889_v32 = vmul.f32 %v1692_v25, %v1692_v25  ;;  %v351_v39 = vpack.c.bf16 %v2865_v22, %v2862_v21 }
  0x99   : > { %v2891_v33 = vmul.f32 %v1693_v26, %v1693_v26  ;;  %v2893_v34 = vmul.f32 %v1694_v29, %v1694_v29  ;;  %v2895_v35 = vmul.f32 %v1695_v30, %v1695_v30  ;;  %v352_v42 = vpack.c.bf16 %v2878_v27, %v2868_v23 }
  0x9a   : > { %v325_v46 = vmul.f32 %v2835_v11, %v2835_v11  ;;  %v326_v47 = vmul.f32 %v2838_v12, %v2838_v12  ;;  %v354_v48 = vpack.c.bf16 %v324_v45, %v323_v44  ;;  %v327_v50 = vmul.f32 %v2846_v15, %v2846_v15 }
  0x9b   : > { %v328_v51 = vmul.f32 %v2849_v16, %v2849_v16  ;;  %v329_v52 = vmul.f32 %v2815_v3, %v2815_v3  ;;  %v331_v56 = vmul.f32 %v2852_v17, %v2852_v17  ;;  %v332_v57 = vmul.f32 %v2855_v18, %v2855_v18 }
  0x9c   : > { %v355_v49 = vpack.c.bf16 %v326_v47, %v325_v46  ;;  %v333_v58 = vmul.f32 %v2862_v21, %v2862_v21  ;;  %v334_v59 = vmul.f32 %v2865_v22, %v2865_v22  ;;  %v335_v62 = vmul.f32 %v2868_v23, %v2868_v23 }
  0x9d   : > { %v356_v54 = vpack.c.bf16 %v328_v51, %v327_v50  ;;  %v357_v55 = vpack.c.bf16 %v330_v53, %v329_v52  ;;  %v358_v60 = vpack.c.bf16 %v332_v57, %v331_v56  ;;  %v336_v63 = vmul.f32 %v2878_v27, %v2878_v27 }
  0x9e   : > { %2104 = vmatmul.mubr.msk.bf16.gmra.mrb[4].mxu0 %vm371_vm0, %v348_v36  ;;  %v359_v61 = vpack.c.bf16 %v334_v59, %v333_v58  ;;  %v337_v0 = vmul.f32 %v2815_v3, %v2809_v1  ;;  %v338_v5 = vmul.f32 %v2818_v4, %v2812_v2  ;;  %v339_v10 = vmul.f32 %v2852_v17, %v2825_v7 }
  0x9f   : > { %2107 = vmatprep.mubr.msk.bf16.mxu0 %vm371_vm0, %v349_v37  ;;  %v360_v6 = vpack.c.bf16 %v336_v63, %v335_v62  ;;  %v340_v14 = vmul.f32 %v2855_v18, %v2828_v8  ;;  %v341_v20 = vmul.f32 %v2862_v21, %v2835_v11  ;;  %v342_v1 = vmul.f32 %v2865_v22, %v2838_v12 }
  0xa0   : > { %v361_v9 = vpack.c.bf16 %v338_v5, %v337_v0  ;;  %v343_v4 = vmul.f32 %v2868_v23, %v2846_v15  ;;  %v344_v7 = vmul.f32 %v2878_v27, %v2849_v16  ;;  %v2389_v15 = vld [vmem:[%s3203_s3] sm:$0xff]  }
  0xa1   : > { %v362_v3 = vpack.c.bf16 %v340_v14, %v339_v10  ;;  %v363_v2 = vpack.c.bf16 %v342_v1, %v341_v20  ;;  %2139 = vmatprep.subr.bf16.mxu1 %v2389_v15 }
  0xa2   : > { %v364_v8 = vpack.c.bf16 %v344_v7, %v343_v4  ;;  %2140 = vmatpush3.bf16.msra.mxu1 %v2389_v15 }
  0xa6   : > { %2108 = vmatmul.mubr.msk.bf16.gmra.mrb[8].mxu0 %vm371_vm0, %v350_v38 }
  0xa7   : > { %2111 = vmatprep.mubr.msk.bf16.mxu0 %vm371_vm0, %v351_v39 }
  0xae   : > { %2112 = vmatmul.mubr.msk.bf16.gmra.mrb[12].mxu0 %vm371_vm0, %v352_v42 }
  0xaf   : > { %2115 = vmatprep.mubr.msk.bf16.mxu0 %vm371_vm0, %v353_v43 }
  0xb6   : > { %2116 = vmatmul.mubr.msk.bf16.gmra.mrb[16].mxu0 %vm371_vm0, %v354_v48 }
  0xb7   : > { %2119 = vmatprep.mubr.msk.bf16.mxu0 %vm371_vm0, %v355_v49 }
  0xbe   : > { %2120 = vmatmul.mubr.msk.bf16.gmra.mrb[20].mxu0 %vm371_vm0, %v356_v54 }
  0xbf   : > { %2123 = vmatprep.mubr.msk.bf16.mxu0 %vm371_vm0, %v357_v55 }
  0xc6   : > { %2124 = vmatmul.mubr.msk.bf16.gmra.mrb[24].mxu0 %vm371_vm0, %v358_v60 }
  0xc7   : > { %2127 = vmatprep.mubr.msk.bf16.mxu0 %vm371_vm0, %v359_v61 }
  0xce   : > { %2128 = vmatmul.mubr.msk.bf16.gmra.mrb[28].mxu0 %vm371_vm0, %v360_v6 }
  0xcf   : > { %2131 = vmatprep.mubr.msk.bf16.mxu0 %vm371_vm0, %v361_v9 }
  0xd6   : > { %2132 = vmatmul.mubr.msk.bf16.gmra.mrb[32].mxu0 %vm371_vm0, %v362_v3 }
  0xd7   : > { %2135 = vmatprep.mubr.msk.bf16.mxu0 %vm371_vm0, %v363_v2 }
  0xde   : > { %2136 = vmatmul.mubr.msk.bf16.gmra.mrb[36].mxu0 %vm371_vm0, %v364_v8 }
 0x169   : > { %v2101_v17 = vpop.f32.mrb[0].mxu0 }
 0x16a   : > { %v466_v11 = vpop.f32.mrb[1].mxu0 }
 0x16b   : > { %v2102_v18 = vpop.f32.mrb[2].mxu0  ;;  %v2248_v21 = vpack.i.bf16 %v2101_v17, %v466_v11 }
 0x16c   : > { %v469_v12 = vpop.f32.mrb[3].mxu0 }
 0x16d   : > { %v2250_v22 = vpack.i.bf16 %v2102_v18, %v469_v12  ;;  %2249 = vxpose.xlu0.b32.start [1/2] (short) (narrow) %v2248_v21, 16 }
 0x171   : > { %2251 = vxpose.xlu0.b32.end [2/2] (short) (narrow) %v2250_v22, 16  ;;  %v2105_v24 = vpop.f32.mrb[4].mxu0 }
 0x172   : > { %v482_v23 = vpop.f32.mrb[5].mxu0 }
 0x173   : > { %v2106_v16 = vpop.f32.mrb[6].mxu0  ;;  %v2262_v25 = vpack.i.bf16 %v2105_v24, %v482_v23 }
 0x174   : > { %v485_v26 = vpop.f32.mrb[7].mxu0 }
 0x175   : > { %v2264_v27 = vpack.i.bf16 %v2106_v16, %v485_v26  ;;  %2263 = vxpose.xlu1.b32.start [1/2] (short) (narrow) %v2262_v25, 16 }
 0x179   : > { %2265 = vxpose.xlu1.b32.end [2/2] (short) (narrow) %v2264_v27, 16  ;;  %v2109_v29 = vpop.f32.mrb[8].mxu0 }
 0x17a   : > { %v498_v30 = vpop.f32.mrb[9].mxu0 }
 0x17b   : > { %v2276_v36 = vpack.i.bf16 %v2109_v29, %v498_v30  ;;  %v2110_v37 = vpop.f32.mrb[10].mxu0 }
 0x17c   : > { %v501_v38 = vpop.f32.mrb[11].mxu0 }
 0x17d   : > { %v2278_v39 = vpack.i.bf16 %v2110_v37, %v501_v38  ;;  %2277 = vxpose.xlu0.b32.start [1/2] (short) (narrow) %v2276_v36, 16 }
 0x181   : > { %2279 = vxpose.xlu0.b32.end [2/2] (short) (narrow) %v2278_v39, 16  ;;  %v2113_v40 = vpop.f32.mrb[12].mxu0 }
 0x182   : > { %v514_v41 = vpop.f32.mrb[13].mxu0 }
 0x183   : > { %v2290_v42 = vpack.i.bf16 %v2113_v40, %v514_v41  ;;  %v2114_v43 = vpop.f32.mrb[14].mxu0 }
 0x184   : > { %v517_v44 = vpop.f32.mrb[15].mxu0 }
 0x185   : > { %v2292_v45 = vpack.i.bf16 %v2114_v43, %v517_v44  ;;  %2291 = vxpose.xlu1.b32.start [1/2] (short) (narrow) %v2290_v42, 16 }
 0x189   : > { %2293 = vxpose.xlu1.b32.end [2/2] (short) (narrow) %v2292_v45, 16  ;;  %v2117_v46 = vpop.f32.mrb[16].mxu0 }
 0x18a   : > { %v530_v47 = vpop.f32.mrb[17].mxu0 }
 0x18b   : > { %v2304_v48 = vpack.i.bf16 %v2117_v46, %v530_v47  ;;  %v2118_v49 = vpop.f32.mrb[18].mxu0 }
 0x18c   : > { %v533_v50 = vpop.f32.mrb[19].mxu0 }
 0x18d   : > { %v2306_v51 = vpack.i.bf16 %v2118_v49, %v533_v50  ;;  %2305 = vxpose.xlu0.b32.start [1/2] (short) (narrow) %v2304_v48, 16 }
 0x191   : > { %2307 = vxpose.xlu0.b32.end [2/2] (short) (narrow) %v2306_v51, 16  ;;  %v2121_v52 = vpop.f32.mrb[20].mxu0 }
 0x192   : > { %v546_v53 = vpop.f32.mrb[21].mxu0 }
 0x193   : > { %v2318_v54 = vpack.i.bf16 %v2121_v52, %v546_v53  ;;  %v2122_v55 = vpop.f32.mrb[22].mxu0 }
 0x194   : > { %v549_v56 = vpop.f32.mrb[23].mxu0 }
 0x195   : > { %v2320_v57 = vpack.i.bf16 %v2122_v55, %v549_v56  ;;  %2319 = vxpose.xlu1.b32.start [1/2] (short) (narrow) %v2318_v54, 16 }
 0x199   : > { %2321 = vxpose.xlu1.b32.end [2/2] (short) (narrow) %v2320_v57, 16  ;;  %v2125_v58 = vpop.f32.mrb[24].mxu0 }
 0x19a   : > { %v562_v59 = vpop.f32.mrb[25].mxu0 }
 0x19b   : > { %v2332_v60 = vpack.i.bf16 %v2125_v58, %v562_v59  ;;  %v2126_v61 = vpop.f32.mrb[26].mxu0 }
 0x19c   : > { %v565_v62 = vpop.f32.mrb[27].mxu0 }
 0x19d   : > { %v2334_v63 = vpack.i.bf16 %v2126_v61, %v565_v62  ;;  %2333 = vxpose.xlu0.b32.start [1/2] (short) (narrow) %v2332_v60, 16 }
 0x1a1   : > { %2335 = vxpose.xlu0.b32.end [2/2] (short) (narrow) %v2334_v63, 16  ;;  %v2129_v0 = vpop.f32.mrb[28].mxu0 }
 0x1a2   : > { %v578_v5 = vpop.f32.mrb[29].mxu0 }
 0x1a3   : > { %v2346_v6 = vpack.i.bf16 %v2129_v0, %v578_v5  ;;  %v2130_v9 = vpop.f32.mrb[30].mxu0 }
 0x1a4   : > { %v581_v10 = vpop.f32.mrb[31].mxu0 }
 0x1a5   : > { %v2348_v14 = vpack.i.bf16 %v2130_v9, %v581_v10  ;;  %2347 = vxpose.xlu1.b32.start [1/2] (short) (narrow) %v2346_v6, 16 }
 0x1a9   : > { %2349 = vxpose.xlu1.b32.end [2/2] (short) (narrow) %v2348_v14, 16  ;;  %v2133_v20 = vpop.f32.mrb[32].mxu0 }
 0x1aa   : > { %v594_v1 = vpop.f32.mrb[33].mxu0 }
 0x1ab   : > { %v2360_v3 = vpack.i.bf16 %v2133_v20, %v594_v1  ;;  %v2134_v2 = vpop.f32.mrb[34].mxu0 }
 0x1ac   : > { %v597_v4 = vpop.f32.mrb[35].mxu0 }
 0x1ad   : > { %v2362_v7 = vpack.i.bf16 %v2134_v2, %v597_v4  ;;  %2361 = vxpose.xlu0.b32.start [1/2] (short) (narrow) %v2360_v3, 16 }
 0x1b1   : > { %2363 = vxpose.xlu0.b32.end [2/2] (short) (narrow) %v2362_v7, 16  ;;  %v2137_v8 = vpop.f32.mrb[36].mxu0 }
 0x1b2   : > { %v610_v17 = vpop.f32.mrb[37].mxu0 }
 0x1b3   : > { %v2374_v11 = vpack.i.bf16 %v2137_v8, %v610_v17  ;;  %v2138_v18 = vpop.f32.mrb[38].mxu0 }
 0x1b4   : > { %v613_v21 = vpop.f32.mrb[39].mxu0 }
 0x1b5   : > { %v2376_v12 = vpack.i.bf16 %v2138_v18, %v613_v21  ;;  %2375 = vxpose.xlu1.b32.start [1/2] (short) (narrow) %v2374_v11, 16 }
 0x1b9   : > { %2377 = vxpose.xlu1.b32.end [2/2] (short) (narrow) %v2376_v12, 16 }
 0x1ed   : > { %v2252_v22 = vpop.trf.xlu0 }
 0x1ee   : > { %v2256_v24 = vunpack.i.h.bf16 %v2252_v22  ;;  %v2253_v23 = vunpack.i.l.bf16 %v2252_v22 }
 0x1f1   : > { %v2257_v15 = vpop.trf.xlu0 }
 0x1f2   : > { %v2261_v16 = vunpack.i.h.bf16 %v2257_v15  ;;  %v2258_v25 = vunpack.i.l.bf16 %v2257_v15 }
 0x1f4   : > { %v1265_v26 = vpack.c.bf16 %v2258_v25, %v2253_v23  ;;  %v1266_v27 = vpack.c.bf16 %v2261_v16, %v2256_v24 }
 0x1f5   : > { %v2266_v29 = vpop.trf.xlu1 }
 0x1f6   : > { %2141 = vmatprep.mubr.msk.bf16.mxu1 %vm371_vm0, %v1265_v26  ;;  %v2270_v30 = vunpack.i.h.bf16 %v2266_v29  ;;  %v2267_v36 = vunpack.i.l.bf16 %v2266_v29 }
 0x1f7   : > { %2142 = vmatmul.mubr.msk.bf16.vlgmr.msra.gmra.mrb[0].mxu1 %vm371_vm0, %v1266_v27 }
 0x1f9   : > { %v2271_v37 = vpop.trf.xlu1 }
 0x1fa   : > { %v2275_v38 = vunpack.i.h.bf16 %v2271_v37  ;;  %v2272_v39 = vunpack.i.l.bf16 %v2271_v37 }
 0x1fc   : > { %v1267_v40 = vpack.c.bf16 %v2272_v39, %v2267_v36  ;;  %v1268_v41 = vpack.c.bf16 %v2275_v38, %v2270_v30 }
 0x1fd   : > { %v2280_v42 = vpop.trf.xlu0 }
 0x1fe   : > { %2145 = vmatprep.mubr.msk.bf16.mxu1 %vm371_vm0, %v1267_v40  ;;  %v2284_v43 = vunpack.i.h.bf16 %v2280_v42  ;;  %v2281_v44 = vunpack.i.l.bf16 %v2280_v42 }
 0x1ff   : > { %2146 = vmatmul.mubr.msk.bf16.gmra.mrb[4].mxu1 %vm371_vm0, %v1268_v41 }
 0x201   : > { %v2285_v45 = vpop.trf.xlu0 }
 0x202   : > { %v2289_v46 = vunpack.i.h.bf16 %v2285_v45  ;;  %v2286_v47 = vunpack.i.l.bf16 %v2285_v45 }
 0x204   : > { %v1269_v48 = vpack.c.bf16 %v2286_v47, %v2281_v44  ;;  %v1270_v49 = vpack.c.bf16 %v2289_v46, %v2284_v43 }
 0x205   : > { %v2294_v50 = vpop.trf.xlu1 }
 0x206   : > { %2149 = vmatprep.mubr.msk.bf16.mxu1 %vm371_vm0, %v1269_v48  ;;  %v2298_v51 = vunpack.i.h.bf16 %v2294_v50  ;;  %v2295_v52 = vunpack.i.l.bf16 %v2294_v50 }
 0x207   : > { %2150 = vmatmul.mubr.msk.bf16.gmra.mrb[8].mxu1 %vm371_vm0, %v1270_v49 }
 0x209   : > { %v2299_v53 = vpop.trf.xlu1 }
 0x20a   : > { %v2303_v54 = vunpack.i.h.bf16 %v2299_v53  ;;  %v2300_v55 = vunpack.i.l.bf16 %v2299_v53 }
 0x20c   : > { %v1271_v56 = vpack.c.bf16 %v2300_v55, %v2295_v52  ;;  %v1272_v57 = vpack.c.bf16 %v2303_v54, %v2298_v51 }
 0x20d   : > { %v2308_v58 = vpop.trf.xlu0 }
 0x20e   : > { %2153 = vmatprep.mubr.msk.bf16.mxu1 %vm371_vm0, %v1271_v56  ;;  %v2312_v59 = vunpack.i.h.bf16 %v2308_v58  ;;  %v2309_v60 = vunpack.i.l.bf16 %v2308_v58 }
 0x20f   : > { %2154 = vmatmul.mubr.msk.bf16.gmra.mrb[12].mxu1 %vm371_vm0, %v1272_v57 }
 0x211   : > { %v2313_v61 = vpop.trf.xlu0 }
 0x212   : > { %v2317_v62 = vunpack.i.h.bf16 %v2313_v61  ;;  %v2314_v63 = vunpack.i.l.bf16 %v2313_v61 }
 0x214   : > { %v1273_v0 = vpack.c.bf16 %v2314_v63, %v2309_v60  ;;  %v1274_v5 = vpack.c.bf16 %v2317_v62, %v2312_v59 }
 0x215   : > { %v2322_v6 = vpop.trf.xlu1 }
 0x216   : > { %2157 = vmatprep.mubr.msk.bf16.mxu1 %vm371_vm0, %v1273_v0  ;;  %v2326_v9 = vunpack.i.h.bf16 %v2322_v6  ;;  %v2323_v10 = vunpack.i.l.bf16 %v2322_v6 }
 0x217   : > { %2158 = vmatmul.mubr.msk.bf16.gmra.mrb[16].mxu1 %vm371_vm0, %v1274_v5 }
 0x219   : > { %v2327_v14 = vpop.trf.xlu1 }
 0x21a   : > { %v2331_v20 = vunpack.i.h.bf16 %v2327_v14  ;;  %v2328_v1 = vunpack.i.l.bf16 %v2327_v14 }
 0x21c   : > { %v1275_v3 = vpack.c.bf16 %v2328_v1, %v2323_v10  ;;  %v1276_v2 = vpack.c.bf16 %v2331_v20, %v2326_v9 }
 0x21d   : > { %v2336_v4 = vpop.trf.xlu0 }
 0x21e   : > { %2161 = vmatprep.mubr.msk.bf16.mxu1 %vm371_vm0, %v1275_v3  ;;  %v2340_v7 = vunpack.i.h.bf16 %v2336_v4  ;;  %v2337_v8 = vunpack.i.l.bf16 %v2336_v4 }
 0x21f   : > { %2162 = vmatmul.mubr.msk.bf16.gmra.mrb[20].mxu1 %vm371_vm0, %v1276_v2 }
 0x221   : > { %v2341_v17 = vpop.trf.xlu0 }
 0x222   : > { %v2345_v11 = vunpack.i.h.bf16 %v2341_v17  ;;  %v2342_v18 = vunpack.i.l.bf16 %v2341_v17 }
 0x224   : > { %v1277_v21 = vpack.c.bf16 %v2342_v18, %v2337_v8  ;;  %v1278_v12 = vpack.c.bf16 %v2345_v11, %v2340_v7 }
 0x225   : > { %v2350_v22 = vpop.trf.xlu1 }
 0x226   : > { %2165 = vmatprep.mubr.msk.bf16.mxu1 %vm371_vm0, %v1277_v21  ;;  %v2354_v24 = vunpack.i.h.bf16 %v2350_v22  ;;  %v2351_v15 = vunpack.i.l.bf16 %v2350_v22 }
 0x227   : > { %2166 = vmatmul.mubr.msk.bf16.gmra.mrb[24].mxu1 %vm371_vm0, %v1278_v12 }
 0x229   : > { %v2355_v23 = vpop.trf.xlu1 }
 0x22a   : > { %v2359_v16 = vunpack.i.h.bf16 %v2355_v23  ;;  %v2356_v25 = vunpack.i.l.bf16 %v2355_v23 }
 0x22c   : > { %v1279_v26 = vpack.c.bf16 %v2356_v25, %v2351_v15  ;;  %v1280_v27 = vpack.c.bf16 %v2359_v16, %v2354_v24 }
 0x22d   : > { %v2364_v29 = vpop.trf.xlu0 }
 0x22e   : > { %2169 = vmatprep.mubr.msk.bf16.mxu1 %vm371_vm0, %v1279_v26  ;;  %v2368_v30 = vunpack.i.h.bf16 %v2364_v29  ;;  %v2365_v36 = vunpack.i.l.bf16 %v2364_v29 }
 0x22f   : > { %2170 = vmatmul.mubr.msk.bf16.gmra.mrb[28].mxu1 %vm371_vm0, %v1280_v27 }
 0x231   : > { %v2369_v37 = vpop.trf.xlu0 }
 0x232   : > { %v2373_v38 = vunpack.i.h.bf16 %v2369_v37  ;;  %v2370_v39 = vunpack.i.l.bf16 %v2369_v37 }
 0x234   : > { %v1281_v40 = vpack.c.bf16 %v2370_v39, %v2365_v36  ;;  %v1282_v41 = vpack.c.bf16 %v2373_v38, %v2368_v30 }
 0x235   : > { %v2378_v42 = vpop.trf.xlu1 }
 0x236   : > { %2173 = vmatprep.mubr.msk.bf16.mxu1 %vm371_vm0, %v1281_v40  ;;  %v2382_v43 = vunpack.i.h.bf16 %v2378_v42  ;;  %v2379_v44 = vunpack.i.l.bf16 %v2378_v42 }
 0x237   : > { %2174 = vmatmul.mubr.msk.bf16.gmra.mrb[32].mxu1 %vm371_vm0, %v1282_v41 }
 0x239   : > { %v2383_v45 = vpop.trf.xlu1 }
 0x23a   : > { %v2387_v46 = vunpack.i.h.bf16 %v2383_v45  ;;  %v2384_v47 = vunpack.i.l.bf16 %v2383_v45 }
 0x23c   : > { %v1283_v48 = vpack.c.bf16 %v2384_v47, %v2379_v44  ;;  %v1284_v49 = vpack.c.bf16 %v2387_v46, %v2382_v43 }
 0x23e   : > { %2177 = vmatprep.mubr.msk.bf16.mxu1 %vm371_vm0, %v1283_v48 }
 0x23f   : > { %2178 = vmatmul.mubr.msk.bf16.gmra.mrb[36].mxu1 %vm371_vm0, %v1284_v49 }
 0x2ca   : > { %v2143_v50 = vpop.f32.mrb[0].mxu1 }
 0x2cb   : > { %v1385_v51 = vpop.f32.mrb[1].mxu1  ;;  %v1546_v59 = vmul.f32 %v2143_v50, %v2143_v50 }
 0x2cc   : > { %v2144_v52 = vpop.f32.mrb[2].mxu1  ;;  %v1544_v63 = vmul.f32 %v1385_v51, %v1385_v51 }
 0x2cd   : > { %v1388_v53 = vpop.f32.mrb[3].mxu1  ;;  %v1547_v9 = vmul.f32 %v2144_v52, %v2144_v52 }
 0x2ce   : > { %v1545_v3 = vmul.f32 %v1388_v53, %v1388_v53 }
 0x2d2   : > { %v2147_v54 = vpop.f32.mrb[4].mxu1 }
 0x2d3   : > { %v1401_v55 = vpop.f32.mrb[5].mxu1  ;;  %v3003_v18 = vmul.f32 %v2147_v54, %v2147_v54 }
 0x2d4   : > { %v2148_v56 = vpop.f32.mrb[6].mxu1  ;;  %v3009_v24 = vmul.f32 %v1401_v55, %v1401_v55 }
 0x2d5   : > { %v1404_v57 = vpop.f32.mrb[7].mxu1  ;;  %v3015_v25 = vmul.f32 %v2148_v56, %v2148_v56 }
 0x2d6   : > { %v3023_v36 = vmul.f32 %v1404_v57, %v1404_v57 }
 0x2da   : > { %v2151_v58 = vpop.f32.mrb[8].mxu1 }
 0x2db   : > { %v1554_v60 = vmul.f32 %v2151_v58, %v2151_v58  ;;  %v2995_v61 = vmul.f32 %v2151_v58, %v2143_v50  ;;  %v1417_v62 = vpop.f32.mrb[9].mxu1 }
 0x2dc   : > { %v1552_v0 = vmul.f32 %v1417_v62, %v1417_v62  ;;  %v2997_v5 = vmul.f32 %v1417_v62, %v1385_v51  ;;  %v2152_v6 = vpop.f32.mrb[10].mxu1 }
 0x2dd   : > { %v1634_v10 = vadd.f32 %v1554_v60, %v1546_v59  ;;  %v1555_v14 = vmul.f32 %v2152_v6, %v2152_v6  ;;  %v2999_v20 = vmul.f32 %v2152_v6, %v2144_v52  ;;  %v1420_v1 = vpop.f32.mrb[11].mxu1 }
 0x2de   : > { %v1632_v2 = vadd.f32 %v1552_v0, %v1544_v63  ;;  %v1553_v4 = vmul.f32 %v1420_v1, %v1420_v1  ;;  %v3001_v7 = vmul.f32 %v1420_v1, %v1388_v53 }
 0x2df   : > { %v1635_v8 = vadd.f32 %v1555_v14, %v1547_v9 }
 0x2e0   : > { %v1633_v17 = vadd.f32 %v1553_v4, %v1545_v3 }
 0x2e2   : > { %v2155_v11 = vpop.f32.mrb[12].mxu1 }
 0x2e3   : > { %v3005_v21 = vmul.f32 %v2155_v11, %v2155_v11  ;;  %v3007_v12 = vmul.f32 %v2155_v11, %v2147_v54  ;;  %v1433_v22 = vpop.f32.mrb[13].mxu1 }
 0x2e4   : > { %v3011_v15 = vmul.f32 %v1433_v22, %v1433_v22  ;;  %v3013_v23 = vmul.f32 %v1433_v22, %v1401_v55  ;;  %v2156_v16 = vpop.f32.mrb[14].mxu1 }
 0x2e5   : > { %v1638_v26 = vadd.f32 %v3005_v21, %v3003_v18  ;;  %v3019_v27 = vmul.f32 %v2156_v16, %v2156_v16  ;;  %v3021_v29 = vmul.f32 %v2156_v16, %v2148_v56  ;;  %v1436_v30 = vpop.f32.mrb[15].mxu1 }
 0x2e6   : > { %v1636_v37 = vadd.f32 %v3011_v15, %v3009_v24  ;;  %v1557_v38 = vmul.f32 %v1436_v30, %v1436_v30  ;;  %v3027_v39 = vmul.f32 %v1436_v30, %v1404_v57 }
 0x2e7   : > { %v1639_v40 = vadd.f32 %v3019_v27, %v3015_v25 }
 0x2e8   : > { %v1637_v41 = vadd.f32 %v1557_v38, %v3023_v36 }
 0x2ea   : > { %v2159_v42 = vpop.f32.mrb[16].mxu1 }
 0x2eb   : > { %v1570_v43 = vsub.f32 %v2159_v42, %v1546_v59  ;;  %v1449_v44 = vpop.f32.mrb[17].mxu1 }
 0x2ec   : > { %v1568_v45 = vsub.f32 %v1449_v44, %v1544_v63  ;;  %v2160_v46 = vpop.f32.mrb[18].mxu1 }
 0x2ed   : > { %v1571_v47 = vsub.f32 %v2160_v46, %v1547_v9  ;;  %v1452_v48 = vpop.f32.mrb[19].mxu1 }
 0x2ee   : > { %v1569_v49 = vsub.f32 %v1452_v48, %v1545_v3 }
 0x2f2   : > { %v2163_v50 = vpop.f32.mrb[20].mxu1 }
 0x2f3   : > { %v1574_v51 = vsub.f32 %v2163_v50, %v3003_v18  ;;  %v1465_v52 = vpop.f32.mrb[21].mxu1  ;;  %v1642_v18 = vadd.f32 0.0001, %v1634_v10 }
 0x2f4   : > { %v1572_v53 = vsub.f32 %v1465_v52, %v3009_v24  ;;  %v2164_v54 = vpop.f32.mrb[22].mxu1  ;;  %v1640_v24 = vadd.f32 0.0001, %v1632_v2 }
 0x2f5   : > { %v1575_v55 = vsub.f32 %v2164_v54, %v3015_v25  ;;  %v1468_v56 = vpop.f32.mrb[23].mxu1  ;;  %v1643_v25 = vadd.f32 0.0001, %v1635_v8 }
 0x2f6   : > { %v1573_v57 = vsub.f32 %v1468_v56, %v3023_v36  ;;  %v1641_v36 = vadd.f32 0.0001, %v1633_v17  ;;  %v1594_v56 = vmul.f32 2.0, %v2995_v61  ;;  %v1646_v17 = vadd.f32 0.0001, %v1638_v26 }
 0x2fa   : > { %v2167_v58 = vpop.f32.mrb[24].mxu1 }
 0x2fb   : > { %v1578_v59 = vsub.f32 %v2167_v58, %v1554_v60  ;;  %v1481_v62 = vpop.f32.mrb[25].mxu1 }
 0x2fc   : > { %v1576_v63 = vsub.f32 %v1481_v62, %v1552_v0  ;;  %v2168_v6 = vpop.f32.mrb[26].mxu1  ;;  %v1644_v62 = vadd.f32 0.0001, %v1636_v37  ;;  %v1595_v37 = vmul.f32 2.0, %v2999_v20 }
 0x2fd   : > { %v1650_v9 = vadd.f32 %v1578_v59, %v1570_v43  ;;  %v1579_v1 = vsub.f32 %v2168_v6, %v1555_v14  ;;  %v1484_v3 = vpop.f32.mrb[27].mxu1  ;;  %v1647_v6 = vadd.f32 0.0001, %v1639_v40 }
 0x2fe   : > { %v1648_v11 = vadd.f32 %v1576_v63, %v1568_v45  ;;  %v1577_v22 = vsub.f32 %v1484_v3, %v1553_v4 }
 0x2ff   : > { %v1658_v16 = vadd.f32 0.0009, %v1650_v9  ;;  %v1651_v30 = vadd.f32 %v1579_v1, %v1571_v47  ;;  %v1645_v1 = vadd.f32 0.0001, %v1637_v41 }
 0x300   : > { %v1656_v42 = vadd.f32 0.0009, %v1648_v11  ;;  %v1649_v44 = vadd.f32 %v1577_v22, %v1569_v49  ;;  %v1593_v22 = vmul.f32 2.0, %v3001_v7 }
 0x301   : > { %v1666_v46 = vmul.f32 %v1658_v16, %v1642_v18  ;;  %v1659_v48 = vadd.f32 0.0009, %v1651_v30  ;;  %v1602_v30 = vadd.f32 0.0001, %v1594_v56 }
 0x302   : > { %v1664_v50 = vmul.f32 %v1656_v42, %v1640_v24  ;;  %v1657_v60 = vadd.f32 0.0009, %v1649_v44  ;;  %v2171_v52 = vpop.f32.mrb[28].mxu1 }
 0x303   : > { %v1667_v0 = vmul.f32 %v1659_v48, %v1643_v25  ;;  %v1582_v43 = vsub.f32 %v2171_v52, %v3005_v21  ;;  %v1497_v14 = vpop.f32.mrb[29].mxu1  ;;  %2390 = vrcp.f32 %v1666_v46  ;;  %v1603_v46 = vadd.f32 0.0001, %v1595_v37 }
 0x304   : > { %v1665_v54 = vmul.f32 %v1657_v60, %v1641_v36  ;;  %v1580_v4 = vsub.f32 %v1497_v14, %v3011_v15  ;;  %v2172_v10 = vpop.f32.mrb[30].mxu1  ;;  %2392 = vrcp.f32 %v1664_v50  ;;  %v1601_v50 = vadd.f32 0.0001, %v1593_v22 }
 0x305   : > { %v1654_v45 = vadd.f32 %v1582_v43, %v1574_v51  ;;  %v1583_v2 = vsub.f32 %v2172_v10, %v3019_v27  ;;  %v1500_v47 = vpop.f32.mrb[31].mxu1  ;;  %2394 = vrcp.f32 %v1667_v0  ;;  %v1598_v0 = vmul.f32 2.0, %v3007_v12 }
 0x306   : > { %v1652_v49 = vadd.f32 %v1580_v4, %v1572_v53  ;;  %v1581_v8 = vsub.f32 %v1500_v47, %v1557_v38  ;;  %v1592_v38 = vmul.f32 2.0, %v2997_v5  ;;  %2396 = vrcp.f32 %v1665_v54 }
 0x307   : > { %v1662_v58 = vadd.f32 0.0009, %v1654_v45  ;;  %v1655_v59 = vadd.f32 %v1583_v2, %v1575_v55  ;;  %v1596_v47 = vmul.f32 2.0, %v3013_v23 }
 0x308   : > { %v1660_v63 = vadd.f32 0.0009, %v1652_v49  ;;  %v1653_v21 = vadd.f32 %v1581_v8, %v1573_v57  ;;  %v1600_v44 = vadd.f32 0.0001, %v1592_v38 }
 0x309   : > { %v1670_v9 = vmul.f32 %v1662_v58, %v1646_v17  ;;  %v1663_v15 = vadd.f32 0.0009, %v1655_v59  ;;  %v1599_v59 = vmul.f32 2.0, %v3021_v29 }
 0x30a   : > { %v1668_v51 = vmul.f32 %v1660_v63, %v1644_v62  ;;  %v1661_v27 = vadd.f32 0.0009, %v1653_v21  ;;  %v2175_v3 = vpop.f32.mrb[32].mxu1 }
 0x30b   : > { %v1671_v53 = vmul.f32 %v1663_v15, %v1647_v6  ;;  %v1586_v26 = vsub.f32 %v2175_v3, %v2995_v61  ;;  %v1513_v55 = vpop.f32.mrb[33].mxu1  ;;  %2398 = vrcp.f32 %v1670_v9  ;;  %v1604_v3 = vadd.f32 0.0001, %v1596_v47 }
 0x30c   : > { %v1669_v11 = vmul.f32 %v1661_v27, %v1645_v1  ;;  %v1584_v40 = vsub.f32 %v1513_v55, %v2997_v5  ;;  %v2176_v57 = vpop.f32.mrb[34].mxu1  ;;  %2400 = vrcp.f32 %v1668_v51  ;;  %v1606_v51 = vadd.f32 0.0001, %v1598_v0 }
 0x30d   : > { %v1610_v41 = vmul.f32 2.0, %v1586_v26  ;;  %v1587_v18 = vsub.f32 %v2176_v57, %v2999_v20  ;;  %v1516_v16 = vpop.f32.mrb[35].mxu1  ;;  %v2391_v52 = vpop.eup %2390  ;;  %2402 = vrcp.f32 %v1671_v53  ;;  %v1607_v26 = vadd.f32 0.0001, %v1599_v59 }
 0x30e   : > { %v1608_v24 = vmul.f32 2.0, %v1584_v40  ;;  %v1585_v42 = vsub.f32 %v1516_v16, %v3001_v7  ;;  %v2393_v54 = vpop.eup %2392  ;;  %2404 = vrcp.f32 %v1669_v11  ;;  %v1743_v59 = vsel (!%p3222_p11), %vm371_vm0, %v2893_v34, 0.0 }
 0x30f   : > { %v1618_v25 = vadd.f32 0.0009, %v1610_v41  ;;  %v1611_v61 = vmul.f32 2.0, %v1587_v18  ;;  %v2395_v2 = vpop.eup %2394 }
 0x310   : > { %v1616_v48 = vadd.f32 0.0009, %v1608_v24  ;;  %v1609_v36 = vmul.f32 2.0, %v1585_v42  ;;  %v2397_v58 = vpop.eup %2396 }
 0x311   : > { %v1626_v5 = vmul.f32 %v1618_v25, %v1602_v30  ;;  %v1619_v60 = vadd.f32 0.0009, %v1611_v61 }
 0x312   : > { %v1624_v20 = vmul.f32 %v1616_v48, %v1600_v44  ;;  %v1617_v43 = vadd.f32 0.0009, %v1609_v36  ;;  %v2179_v14 = vpop.f32.mrb[36].mxu1 }
 0x313   : > { %v3048_v7 = vmul.f32 %v2391_v52, %v1626_v5  ;;  %v1627_v4 = vmul.f32 %v1619_v60, %v1603_v46  ;;  %v1590_v10 = vsub.f32 %v2179_v14, %v3007_v12  ;;  %v1529_v45 = vpop.f32.mrb[37].mxu1  ;;  %v1597_v12 = vmul.f32 2.0, %v3027_v39 }
 0x314   : > { %v3052_v49 = vmul.f32 %v2393_v54, %v1624_v20  ;;  %v1625_v8 = vmul.f32 %v1617_v43, %v1601_v50  ;;  %v1588_v56 = vsub.f32 %v1529_v45, %v3013_v23  ;;  %v2180_v17 = vpop.f32.mrb[38].mxu1  ;;  %v1732_v50 = vsel (!%p3222_p11), %vm371_vm0, %v2841_v13, 0.0 }
 0x315   : > { %v3056_v62 = vmul.f32 %v2395_v2, %v1627_v4  ;;  %v1614_v63 = vmul.f32 2.0, %v1590_v10  ;;  %v1591_v21 = vsub.f32 %v2180_v17, %v3021_v29  ;;  %v1532_v6 = vpop.f32.mrb[39].mxu1  ;;  %v2399_v11 = vpop.eup %2398  ;;  %v1605_v29 = vadd.f32 0.0001, %v1597_v12 }
 0x316   : > { %v3060_v9 = vmul.f32 %v2397_v58, %v1625_v8  ;;  %v1612_v15 = vmul.f32 2.0, %v1588_v56  ;;  %v1589_v1 = vsub.f32 %v1532_v6, %v3027_v39  ;;  %v2401_v22 = vpop.eup %2400  ;;  %v1708_v25 = vsel (!%p3222_p11), %vm371_vm0, %v3052_v49, 0.0 }
 0x317   : > { %v1622_v27 = vadd.f32 0.0009, %v1614_v63  ;;  %v1615_v23 = vmul.f32 2.0, %v1591_v21  ;;  %v2403_v16 = vpop.eup %2402  ;;  %v1711_v46 = vsel (!%p3222_p11), %vm371_vm0, %v3048_v7, 0.0  ;;  %v1713_v36 = vsel (!%p3222_p11), %vm371_vm0, %v3056_v62, 0.0 }
 0x318   : > { %v1620_v38 = vadd.f32 0.0009, %v1612_v15  ;;  %v1613_v53 = vmul.f32 2.0, %v1589_v1  ;;  %v2405_v24 = vpop.eup %2404  ;;  %1707 = sbr.rel (%p3222_p11) target bundleno = 1019 (0x3fb), region = 52  ;;  %v1709_v61 = vsel (!%p3222_p11), %vm371_vm0, %v3060_v9, 0.0  ;;  %v1733_v5 = vsel (!%p3222_p11), %vm371_vm0, %v2857_v19, 0.0 }
 0x319   : > { %v1630_v55 = vmul.f32 %v1622_v27, %v1606_v51  ;;  %v1623_v37 = vadd.f32 0.0009, %v1615_v23  ;;  %v1710_v48 = vadd.f32 (!%p3222_p11), %v1709_v61, %v1708_v25  ;;  %v1735_v60 = vsel (!%p3222_p11), %vm371_vm0, %v2881_v28, 0.0 }
 0x31a   : > { %v1628_v40 = vmul.f32 %v1620_v38, %v1604_v3  ;;  %v1621_v57 = vadd.f32 0.0009, %v1613_v53  ;;  %v1734_v0 = vadd.f32 (!%p3222_p11), %v1733_v5, %v1732_v50  ;;  %v1737_v43 = vsel (!%p3222_p11), %vm371_vm0, %v2887_v31, 0.0 }
 0x31b   : > { %v3063_v41 = vmul.f32 %v2399_v11, %v1630_v55  ;;  %v1631_v18 = vmul.f32 %v1623_v37, %v1607_v26  ;;  %v1712_v52 = vadd.f32 (!%p3222_p11), %v1711_v46, %v1710_v48  ;;  %v1739_v10 = vsel (!%p3222_p11), %vm371_vm0, %v2889_v32, 0.0 }
 0x31c   : > { %v3065_v39 = vmul.f32 %v2401_v22, %v1628_v40  ;;  %v1629_v30 = vmul.f32 %v1621_v57, %v1605_v29  ;;  %v1736_v54 = vadd.f32 (!%p3222_p11), %v1735_v60, %v1734_v0  ;;  %v1741_v8 = vsel (!%p3222_p11), %vm371_vm0, %v2891_v33, 0.0 }
 0x31d   : > { %v3067_v42 = vmul.f32 %v2403_v16, %v1631_v18  ;;  %v1714_v14 = vadd.f32 (!%p3222_p11), %v1713_v36, %v1712_v52  ;;  %v1719_v47 = vsel (!%p3222_p11), %vm371_vm0, %v3063_v41, 0.0  ;;  %v1745_v6 = vsel (!%p3222_p11), %vm371_vm0, %v2895_v35, 0.0 }
 0x31e   : > { %v3069_v44 = vmul.f32 %v2405_v24, %v1629_v30  ;;  %v1715_v20 = vsel (!%p3222_p11), %vm371_vm0, %v3065_v39, 0.0  ;;  %v1738_v2 = vadd.f32 (!%p3222_p11), %v1737_v43, %v1736_v54  ;;  %v1756_v18 = vlaneseq (!%p3222_p11) }
 0x31f   : > { %v1716_v45 = vadd.f32 %v1715_v20, %v1714_v14  ;;  %v1721_v58 = vsel %vm371_vm0, %v3067_v42, 0.0 }
 0x320   : > { %v1717_v4 = vsel %vm371_vm0, %v3069_v44, 0.0  ;;  %v1740_v17 = vadd.f32 %v1739_v10, %v1738_v2  ;;  %v1757_v16 = vshrl.u32 %v1756_v18, 7 }
 0x321   : > { %v1718_v56 = vadd.f32 %v1717_v4, %v1716_v45 }
 0x322   : > { %v1742_v21 = vadd.f32 %v1741_v8, %v1740_v17  ;;  %vm1759_vm1 = vcmp.eq.s32.totalorder %v1757_v16, 1  ;;  %vm1758_vm2 = vcmp.eq.s32.totalorder %v1757_v16, 0 }
 0x323   : > { %v1720_v63 = vadd.f32 %v1719_v47, %v1718_v56 }
 0x324   : > { %v1744_v15 = vadd.f32 %v1743_v59, %v1742_v21 }
 0x325   : > { %v1722_v12 = vadd.f32 %v1721_v58, %v1720_v63 }
 0x326   : > { %v1746_v1 = vadd.f32 %v1745_v6, %v1744_v15 }
 0x327   : > { %1723 = vadd.xlane.f32.xlu0 %v1722_v12 }
 0x32b   : > { %1747 = vadd.xlane.f32.xlu0 %v1746_v1 }
 0x3b4   : > { %v1724_v51 = vpop.xlane.xlu0 %1723 }
 0x3b5   : > { %v1725_v27 = vrot.slane %v1724_v51, 4 }
 0x3b7   : > { %v1726_v23 = vadd.f32 %v1725_v27, %v1724_v51 }
 0x3b8   : > { %v1748_v3 = vpop.xlane.xlu0 %1747 }
 0x3b9   : > { %v1727_v38 = vrot.slane %v1726_v23, 2  ;;  %v1749_v53 = vrot.slane %v1748_v3, 4 }
 0x3bb   : > { %v1750_v26 = vadd.f32 %v1749_v53, %v1748_v3  ;;  %v1728_v55 = vadd.f32 %v1727_v38, %v1726_v23 }
 0x3bd   : > { %v1751_v37 = vrot.slane %v1750_v26, 2  ;;  %v1729_v11 = vrot.slane %v1728_v55, 1 }
 0x3bf   : > { %v1752_v29 = vadd.f32 %v1751_v37, %v1750_v26  ;;  %v1730_v40 = vadd.f32 %v1729_v11, %v1728_v55 }
 0x3c1   : > { %2181 = vpush %v1730_v40  ;;  %v1753_v57 = vrot.slane %v1752_v29, 1 }
 0x3c3   : > { %v1754_v22 = vadd.f32 %v1753_v57, %v1752_v29 }
 0x3c5   : > { %2183 = vpush %v1754_v22 }
 0x3f2   : > { %s2182_s14 = spop %2181 }
 0x3f3   : > { %v1762_v24 = vstv %s2182_s14 }
 0x3f6   : > { %s2184_s6 = spop %2183 }
 0x3f7   : > { %v1760_v30 = vstv %s2184_s6 }
 0x3f8   : > { %v1761_v25 = vsel %vm1759_vm1, %v1760_v30, 0.0 }
 0x3f9   : > { %v1763_v61 = vsel %vm1758_vm2, %v1762_v24, %v1761_v25 }
 0x3fa   : > { %1764 = vst [vmem:[%s3073_s12] sm:$0xff] %v1763_v61 }
 0x3fb PF: > { %p2039_p13 = scmp.ne.s32.totalorder %s2622_s19, 1 }
 0x3fc   : > { %s2040_s25 = sshll.u32 (!%p2039_p13), %s2622_s19, 2 }
 0x3fd   : > { %1768 = sbr.rel (%p2039_p13) target bundleno = 1251 (0x4e3), region = 56  ;;  %v1770_v46 = vstv (!%p2039_p13), %s2040_s25 }
 0x3fe   : > { %v1771_v48 = vadd.s32 (!%p2039_p13), 1, %v1770_v46  ;;  %v1772_v36 = vadd.s32 (!%p2039_p13), 2, %v1770_v46  ;;  %vm1774_vm3 = vcmp.lt.s32.totalorder (!%p2039_p13), %v1770_v46, 6  ;;  %v1773_v60 = vadd.s32 (!%p2039_p13), 3, %v1770_v46 }
 0x3ff   : > { %v1778_v50 = vsel (!%p2039_p13), %vm1774_vm3, %v3052_v49, 0.0  ;;  %v1779_v5 = vsel (!%p2039_p13), %vm1774_vm3, %v3060_v9, 0.0  ;;  %v1810_v9 = vsel (!%p2039_p13), %vm1774_vm3, %v2841_v13, 0.0  ;;  %v1811_v4 = vsel (!%p2039_p13), %vm1774_vm3, %v2857_v19, 0.0 }
 0x400   : > { %vm1775_vm4 = vcmp.lt.s32.totalorder (!%p2039_p13), %v1771_v48, 6  ;;  %vm1776_vm5 = vcmp.lt.s32.totalorder (!%p2039_p13), %v1772_v36, 6  ;;  %v1786_v52 = vsel (!%p2039_p13), %vm371_vm0, %v1778_v50, 0.0  ;;  %v1787_v43 = vsel (!%p2039_p13), %vm371_vm0, %v1779_v5, 0.0 }
 0x401   : > { %v1780_v0 = vsel (!%p2039_p13), %vm1775_vm4, %v3048_v7, 0.0  ;;  %v1781_v20 = vsel (!%p2039_p13), %vm1775_vm4, %v3056_v62, 0.0  ;;  %v1782_v49 = vsel (!%p2039_p13), %vm1776_vm5, %v3065_v39, 0.0  ;;  %v1788_v54 = vadd.f32 (!%p2039_p13), %v1787_v43, %v1786_v52 }
 0x402   : > { %v1789_v14 = vsel (!%p2039_p13), %vm371_vm0, %v1780_v0, 0.0  ;;  %vm1777_vm6 = vcmp.lt.s32.totalorder (!%p2039_p13), %v1773_v60, 6  ;;  %v1791_v10 = vsel (!%p2039_p13), %vm371_vm0, %v1781_v20, 0.0  ;;  %v1812_v7 = vsel (!%p2039_p13), %vm1775_vm4, %v2881_v28, 0.0 }
 0x403   : > { %v1783_v62 = vsel (!%p2039_p13), %vm1776_vm5, %v3069_v44, 0.0  ;;  %v1790_v45 = vadd.f32 (!%p2039_p13), %v1789_v14, %v1788_v54  ;;  %v1813_v2 = vsel (!%p2039_p13), %vm1775_vm4, %v2887_v31, 0.0  ;;  %v1793_v39 = vsel (!%p2039_p13), %vm371_vm0, %v1782_v49, 0.0 }
 0x404   : > { %v1818_v47 = vsel %vm371_vm0, %v1810_v9, 0.0  ;;  %v1819_v13 = vsel %vm371_vm0, %v1811_v4, 0.0  ;;  %v1821_v19 = vsel %vm371_vm0, %v1812_v7, 0.0  ;;  %v1784_v8 = vsel %vm1777_vm6, %v3063_v41, 0.0 }
 0x405   : > { %v1792_v56 = vadd.f32 %v1791_v10, %v1790_v45  ;;  %v1814_v28 = vsel %vm1776_vm5, %v2889_v32, 0.0  ;;  %v1820_v44 = vadd.f32 %v1819_v13, %v1818_v47  ;;  %v1795_v17 = vsel %vm371_vm0, %v1783_v62, 0.0 }
 0x406   : > { %v1823_v31 = vsel %vm371_vm0, %v1813_v2, 0.0  ;;  %v1785_v58 = vsel %vm1777_vm6, %v3067_v42, 0.0  ;;  %v1815_v63 = vsel %vm1776_vm5, %v2891_v33, 0.0  ;;  %v1797_v6 = vsel %vm371_vm0, %v1784_v8, 0.0 }
 0x407   : > { %v1794_v59 = vadd.f32 %v1793_v39, %v1792_v56  ;;  %v1822_v21 = vadd.f32 %v1821_v19, %v1820_v44  ;;  %v1825_v41 = vsel %vm371_vm0, %v1814_v28, 0.0  ;;  %v1816_v32 = vsel %vm1777_vm6, %v2893_v34, 0.0 }
 0x408   : > { %v1799_v1 = vsel %vm371_vm0, %v1785_v58, 0.0  ;;  %v1827_v51 = vsel %vm371_vm0, %v1815_v63, 0.0  ;;  %v1817_v42 = vsel %vm1777_vm6, %v2895_v35, 0.0  ;;  %v1829_v33 = vsel %vm371_vm0, %v1816_v32, 0.0 }
 0x409   : > { %v1796_v12 = vadd.f32 %v1795_v17, %v1794_v59  ;;  %v1824_v15 = vadd.f32 %v1823_v31, %v1822_v21  ;;  %v1831_v53 = vsel %vm371_vm0, %v1817_v42, 0.0  ;;  %v1842_v46 = vlaneseq }
 0x40b   : > { %v1798_v27 = vadd.f32 %v1797_v6, %v1796_v12  ;;  %v1826_v23 = vadd.f32 %v1825_v41, %v1824_v15  ;;  %v1843_v48 = vshrl.u32 %v1842_v46, 7 }
 0x40d   : > { %v1800_v3 = vadd.f32 %v1799_v1, %v1798_v27  ;;  %v1828_v38 = vadd.f32 %v1827_v51, %v1826_v23  ;;  %vm1845_vm7 = vcmp.eq.s32.totalorder %v1843_v48, 1  ;;  %vm1844_vm8 = vcmp.eq.s32.totalorder %v1843_v48, 0 }
 0x40f   : > { %1801 = vadd.xlane.f32.xlu0 %v1800_v3  ;;  %v1830_v26 = vadd.f32 %v1829_v33, %v1828_v38 }
 0x411   : > { %v1832_v55 = vadd.f32 %v1831_v53, %v1830_v26 }
 0x413   : > { %1833 = vadd.xlane.f32.xlu0 %v1832_v55 }
 0x49c   : > { %v1802_v34 = vpop.xlane.xlu0 %1801 }
 0x49d   : > { %v1803_v37 = vrot.slane %v1802_v34, 4 }
 0x49f   : > { %v1804_v11 = vadd.f32 %v1803_v37, %v1802_v34 }
 0x4a0   : > { %v1834_v29 = vpop.xlane.xlu0 %1833 }
 0x4a1   : > { %v1805_v40 = vrot.slane %v1804_v11, 2  ;;  %v1835_v57 = vrot.slane %v1834_v29, 4 }
 0x4a3   : > { %v1836_v22 = vadd.f32 %v1835_v57, %v1834_v29  ;;  %v1806_v18 = vadd.f32 %v1805_v40, %v1804_v11 }
 0x4a5   : > { %v1837_v35 = vrot.slane %v1836_v22, 2  ;;  %v1807_v16 = vrot.slane %v1806_v18, 1 }
 0x4a7   : > { %v1838_v30 = vadd.f32 %v1837_v35, %v1836_v22  ;;  %v1808_v24 = vadd.f32 %v1807_v16, %v1806_v18 }
 0x4a9   : > { %2185 = vpush %v1808_v24  ;;  %v1839_v25 = vrot.slane %v1838_v30, 1 }
 0x4ab   : > { %v1840_v61 = vadd.f32 %v1839_v25, %v1838_v30 }
 0x4ad   : > { %2187 = vpush %v1840_v61 }
 0x4da   : > { %s2186_s11 = spop %2185 }
 0x4db   : > { %v1848_v50 = vstv %s2186_s11 }
 0x4de   : > { %s2188_s22 = spop %2187 }
 0x4df   : > { %v1846_v36 = vstv %s2188_s22 }
 0x4e0   : > { %v1847_v5 = vsel %vm1845_vm7, %v1846_v36, 0.0 }
 0x4e1   : > { %v1849_v60 = vsel %vm1844_vm8, %v1848_v50, %v1847_v5 }
 0x4e2   : > { %1850 = vst [vmem:[%s3073_s12] sm:$0xff] %v1849_v60 }
 0x4e3 PF: > { %s2042_s7 = sshll.u32 %s2622_s19, 7  ;;  %s1865_s13 = sshll.u32 %s3073_s12, 4  ;;  %s1866_s13 = int_to_ptr.vmem [resolvable:$true] %s1865_s13 }
 0x4e4   : > { %s3161_s5 = scalar_lea.hbm %s3204_s4, %s2042_s7  ;;  %s1852_s29 = scalar_lea.sflag [#allocation4], %s2786_s8 }
 0x4e5   : > { %s2490_s20 = scalar_lea.vmem %s1866_s13, 128  ;;  %p3223_p12 = scmp.ne.s32.totalorder %s3212_s27, 0 }
 0x4e6   : > { %p2491_p2 = scmp.ne.s32.totalorder %s1866_s13, %s2490_s20  ;;  %s2575_s23 = smov [#allocation8]  }
 0x4e7   : > { %s2494_s26 = sshll.u32 %s2575_s23, 4  ;;  %s2495_s26 = int_to_ptr.vmem [resolvable:$false] %s2494_s26 }
 0x4e8   : > { %p2492_p3 = pnand %p2491_p2, %p3223_p12  ;;  %s2496_s30 = scalar_lea.vmem %s2495_s26, 256 }
 0x4e9   : > { %p2497_p9 = scmp.lt.s32.totalorder %s1866_s13, %s2495_s26  ;;  %p2498_p1 = scmp.lt.s32.totalorder %s2496_s30, %s2490_s20 }
 0x4ea   : > { %p2493_p8 = pneg %p2492_p3 }
 0x4eb   : > { %p2499_p4 = por %p2498_p1, %p2497_p9 }
 0x4ed   : > { %p2500_p10 = pnand %p2499_p4, %p2493_p8 }
 0x4ef   : > { %2503 = shalt.err (!%p2500_p10)
}
 0x4f0   : > { %s2504_s19 = scalar_lea.hbm %s3161_s5, 128  ;;  %s2508_s14 = scalar_lea.hbm %s3204_s4, 256 }
 0x4f1   : > { %p2505_p5 = scmp.ne.s32.totalorder %s3161_s5, %s2504_s19  ;;  %p2509_p11 = scmp.lt.u32.totalorder %s3161_s5, %s3204_s4 }
 0x4f2   : > { %p2510_p13 = scmp.lt.u32.totalorder %s2508_s14, %s2504_s19  ;;  %p2512_p3 = scmp.lt.u32.totalorder %s2504_s19, %s3161_s5 }
 0x4f3   : > { %p2506_p6 = pnand %p2505_p5, %p3223_p12 }
 0x4f4   : > { %p2511_p2 = por %p2510_p13, %p2509_p11 }
 0x4f5   : > { %p2507_p7 = pneg %p2506_p6 }
 0x4f6   : > { %p2513_p8 = por %p2512_p3, %p2511_p2 }
 0x4f8   : > { %p2514_p9 = pnand %p2513_p8, %p2507_p7 }
 0x4fa   : > { %2517 = shalt.err (!%p2514_p9)
}
 0x4fb   : > { %2195 = dma.vmem_to_hbm [thread:$0]  (%p3223_p12), %s1866_s13, 128, %s3161_s5, %s1852_s29  }
 0x4fc PF: > { %s1877_s11 = sand.u32 1, %s2552_s15   ;;  %p3224_p1 = scmp.ne.s32.totalorder %s3213_s28, 0 }
 0x4fd   : > { %s1878_s22 = scalar_lea.sflag [#allocation4], %s1877_s11 }
 0x4fe   : > { %p2202_p4 = pnand %p1970_p0, %p3224_p1 }
 0x500   : > { %2547 = dma.done.wait (!%p2202_p4), %s1878_s22, 128  }
 0x501   : > { %2549 = vsyncadd (!%p2202_p4), %s1878_s22, 4294967168  ;;  %p20_p10 = scmp.ge.s32.totalorder %s2626_s21, 4   ;;  %s3225_s15 = smov %s2556_s16 }
 0x502   : > { %s3226_s16 = smov %s2560_s17  ;;  %s3227_s17 = smov %s2638_s24 }
 0x503   : > { %s3228_s18 = smov %s2626_s21  ;;  %22 = sbr.rel (!%p20_p10) target bundleno = 7 (0x7), region = 106 }
 0x50a   :  { %1883 = vsyncpa [#allocation3], 1 }
 0x50b   :  { %1885 = vsyncpa [#allocation3 + $0x1], 1 }
 0x50c   :  { %1886 = vsyncpa [#allocation6], 1 }
 0x50d   :  { %1888 = vsyncpa [#allocation6 + $0x1], 1 }
 0x50e   :  { %1889 = vsyncpa [#allocation4], 1 }
 0x50f   :  { %1891 = vsyncpa [#allocation4 + $0x1], 1 }

</bundles_post_ra>
